<compile_context>
chip_gen: v5e
topology: v5e:2x2
jax: 0.10.0
libtpu: 0.0.40
codegen_flags: <defaults>
</compile_context>

<pallas_src>
import functools
import math

import jax
import jax.numpy as jnp
from jax import lax
from jax.experimental import pallas as pl
from jax.experimental.pallas import tpu as pltpu


def _fused_inception_dw_kernel(w_hw_ref, b_hw_ref, w_w_ref, b_w_ref,
                               w_h_ref, b_h_ref, x_ref, o_ref, xpad_ref,
                               *, sq, band):
    """One (batch, branch) grid step.

    x_ref / o_ref : (gc, H, W) conv-channel block of the current branch.
    xpad_ref      : (gc, H + 2*pb, W + 2*pb) f32 zero-padded staging scratch.
    w_*_ref       : (taps, gc, 1, 1) f32 per-tap per-channel weights (VMEM).
    b_*_ref       : (gc, 1, 1) f32 bias (VMEM).
    """
    gc, H, W = x_ref.shape
    pb = (xpad_ref.shape[1] - H) // 2

    # Stage the channel slab into the zero-padded f32 buffer (halo = zeros).
    # One cheap full-width store pass + one interior store per step; this
    # replaces per-tap accumulator read-modify-writes of the old version.
    xpad_ref[...] = jnp.zeros_like(xpad_ref)
    xpad_ref[:, pb:pb + H, pb:pb + W] = x_ref[...].astype(jnp.float32)

    def run_branch(w_ref, b_ref, kh, kw):
        ph, pw = kh // 2, kw // 2
        acc = jnp.zeros((gc, H, W), jnp.float32)     # functional accumulator
        t = 0
        for i in range(kh):
            for j in range(kw):
                r0 = pb + i - ph
                c0 = pb + j - pw
                # Full-size shifted tap: 1 load + broadcast-mul + add per tap.
                acc = acc + xpad_ref[:, r0:r0 + H, c0:c0 + W] * w_ref[t]
                t += 1
        # Bias folded into the store epilogue; single store per channel slab.
        o_ref[...] = (acc + b_ref[...]).astype(o_ref.dtype)

    br = pl.program_id(1)

    @pl.when(br == 0)
    def _():
        run_branch(w_hw_ref, b_hw_ref, sq, sq)       # square  (sq x sq)

    @pl.when(br == 1)
    def _():
        run_branch(w_w_ref, b_w_ref, 1, band)        # band    (1 x band)

    @pl.when(br == 2)
    def _():
        run_branch(w_h_ref, b_h_ref, band, 1)        # band    (band x 1)


def _pack_weight(w, kh, kw):
    """(gc, kh, kw) -> (kh*kw, gc, 1, 1) f32, tap index t = i*kw + j."""
    gc = w.shape[0]
    return jnp.transpose(w.reshape(gc, kh * kw), (1, 0)).reshape(
        kh * kw, gc, 1, 1).astype(jnp.float32)


def inception_dwconv2d_pallas(x, w_hw, b_hw, w_w, b_w, w_h, b_h, *,
                              c_id, gc, sq, band):
    """x: (N, C, H, W) NCHW. Identity channels pass through via output aliasing;
    the three depthwise branches are computed in-kernel."""
    N, C, H, W = x.shape
    assert gc > 0 and C == c_id + 3 * gc
    assert sq % 2 == 1 and band % 2 == 1
    # TODO(synk): support c_id % gc != 0 via pl.BoundedSlice channel blocks.
    assert c_id % gc == 0, (
        "identity-channel count must be a multiple of gc so the aliased "
        "conv-channel blocks land on channel-block boundaries")
    c_base = c_id // gc
    pb = max(sq // 2, band // 2)

    kernel = functools.partial(_fused_inception_dw_kernel, sq=sq, band=band)

    w_hw4 = _pack_weight(w_hw, sq, sq)
    w_w4 = _pack_weight(w_w, 1, band)
    w_h4 = _pack_weight(w_h, band, 1)
    b_hw3 = b_hw.reshape(gc, 1, 1).astype(jnp.float32)
    b_w3 = b_w.reshape(gc, 1, 1).astype(jnp.float32)
    b_h3 = b_h.reshape(gc, 1, 1).astype(jnp.float32)

    itemsize = x.dtype.itemsize
    slab = gc * H * W
    # in + out blocks (double-buffered) + padded f32 staging + f32 temporaries.
    vmem_needed = (4 * slab * itemsize
                   + gc * (H + 2 * pb) * (W + 2 * pb) * 4
                   + 4 * slab * 4 + (1 << 20))
    # Cap below v7x's 64 MiB physical per-TC VMEM to keep pipelining headroom;
    # on v5e/v6e (128 MiB) the per-branch slab is already in the multi-MiB
    # sweet spot for realistic InceptionNeXt shapes.
    vmem_limit = int(min(max(vmem_needed, 32 << 20), 48 << 20))

    flops = 2 * N * gc * H * W * (sq * sq + 2 * band)
    # Only the conv channels move: identity channels stay in the aliased buffer.
    bytes_accessed = 2 * N * 3 * slab * itemsize

    def wspec(a):
        return pl.BlockSpec(a.shape, lambda n, br, _nd=a.ndim: (0,) * _nd)

    xspec = pl.BlockSpec((pl.Squeezed(), gc, H, W),
                         lambda n, br: (n, c_base + br, 0, 0))

    return pl.pallas_call(
        kernel,
        out_shape=jax.ShapeDtypeStruct((N, C, H, W), x.dtype),
        grid=(N, 3),
        in_specs=[wspec(w_hw4), wspec(b_hw3), wspec(w_w4), wspec(b_w3),
                  wspec(w_h4), wspec(b_h3), xspec],
        out_specs=xspec,
        scratch_shapes=[pltpu.VMEM((gc, H + 2 * pb, W + 2 * pb), jnp.float32)],
        input_output_aliases={6: 0},   # out aliases x: identity channels free
        compiler_params=pltpu.CompilerParams(
            dimension_semantics=("parallel", "parallel"),
            vmem_limit_bytes=vmem_limit),
        cost_estimate=pl.CostEstimate(flops=flops, transcendentals=0,
                                      bytes_accessed=bytes_accessed),
    )(w_hw4, b_hw3, w_w4, b_w3, w_h4, b_h3, x)


class InceptionDWConv2dPallas:
    """JAX/Pallas port of InceptionDWConv2d (forward only)."""

    def __init__(self, in_channels, square_kernel_size=3, band_kernel_size=11,
                 branch_ratio=0.125, key=None):
        gc = int(in_channels * branch_ratio)
        self.gc = gc
        self.sq = square_kernel_size
        self.band = band_kernel_size
        self.split_indexes = (in_channels - 3 * gc, gc, gc, gc)

        if key is None:
            key = jax.random.PRNGKey(0)
        ks = jax.random.split(key, 6)

        def init_conv(kh_, kw_, kkey_w, kkey_b):
            # PyTorch Conv2d default init (groups=gc, 1 in-ch per group)
            fan_in = kh_ * kw_
            bound_w = math.sqrt(6.0 / ((1.0 + 5.0) * fan_in))  # kaiming_uniform a=sqrt(5)
            bound_b = 1.0 / math.sqrt(fan_in)
            w = jax.random.uniform(kkey_w, (gc, kh_, kw_), jnp.float32,
                                   minval=-bound_w, maxval=bound_w)
            b = jax.random.uniform(kkey_b, (gc,), jnp.float32,
                                   minval=-bound_b, maxval=bound_b)
            return w, b

        self.w_hw, self.b_hw = init_conv(self.sq, self.sq, ks[0], ks[1])
        self.w_w, self.b_w = init_conv(1, self.band, ks[2], ks[3])      # (1, band)
        self.w_h, self.b_h = init_conv(self.band, 1, ks[4], ks[5])      # (band, 1)

        # Donate x: the kernel output aliases x's buffer, so the identity
        # channels pass through with zero HBM traffic.  (Callers that need x
        # afterwards should keep their own copy.)
        self._fwd = jax.jit(
            functools.partial(inception_dwconv2d_pallas,
                              c_id=self.split_indexes[0], gc=self.gc,
                              sq=self.sq, band=self.band),
            donate_argnums=(0,))

    def __call__(self, x):
        return self._fwd(x, self.w_hw, self.b_hw, self.w_w, self.b_w,
                         self.w_h, self.b_h)


def _ref_depthwise(x, weight, bias, kh, kw):
    """Pure-JAX reference using lax.conv_general_dilated (depthwise)."""
    C = x.shape[1]
    w = weight.reshape(C, 1, kh, kw)
    ph, pw = kh // 2, kw // 2
    y = lax.conv_general_dilated(
        x, w, window_strides=(1, 1), padding=[(ph, ph), (pw, pw)],
        dimension_numbers=("NCHW", "OIHW", "NCHW"), feature_group_count=C)
    return y + bias[None, :, None, None]


if __name__ == "__main__":
    key = jax.random.PRNGKey(0)
    k_x, k_mod = jax.random.split(key)

    N, C_in, H, W = 2, 32, 16, 16          # gc = 32 * 0.125 = 4, identity = 20
    x = jax.random.normal(k_x, (N, C_in, H, W), jnp.float32)

    mod = InceptionDWConv2dPallas(C_in, key=k_mod)

    # Reference (pure JAX) computed BEFORE the kernel call, since x is donated
    # to the kernel (the output aliases x's buffer).
    c_id, gc = mod.split_indexes[0], mod.gc
    ref = jnp.concatenate((
        x[:, :c_id],
        _ref_depthwise(x[:, c_id:c_id + gc], mod.w_hw, mod.b_hw, mod.sq, mod.sq),
        _ref_depthwise(x[:, c_id + gc:c_id + 2 * gc], mod.w_w, mod.b_w, 1, mod.band),
        _ref_depthwise(x[:, c_id + 2 * gc:], mod.w_h, mod.b_h, mod.band, 1),
    ), axis=1)
    ref = jax.block_until_ready(ref)

    out = jax.block_until_ready(mod(x))
    assert out.shape == (N, C_in, H, W)
    err = float(jnp.max(jnp.abs(out - ref)))
    assert err < 1e-4, err

    print("KERNEL_OK")
</pallas_src>

<mosaic_0001>
module attributes {stable_mosaic.version = 11 : i64} {
  func.func @_fused_inception_dw_kernel(%arg0: i32, %arg1: i32, %arg2: memref<9x4x1x1xf32, #tpu.memory_space<vmem>>, %arg3: memref<4x1x1xf32, #tpu.memory_space<vmem>>, %arg4: memref<11x4x1x1xf32, #tpu.memory_space<vmem>>, %arg5: memref<4x1x1xf32, #tpu.memory_space<vmem>>, %arg6: memref<11x4x1x1xf32, #tpu.memory_space<vmem>>, %arg7: memref<4x1x1xf32, #tpu.memory_space<vmem>>, %arg8: memref<1x4x16x16xf32, #tpu.memory_space<vmem>>, %arg9: memref<1x4x16x16xf32, #tpu.memory_space<vmem>>, %arg10: memref<4x26x26xf32, #tpu.memory_space<vmem>>) attributes {dimension_semantics = [#tpu.dimension_semantics<parallel>, #tpu.dimension_semantics<parallel>], iteration_bounds = array<i64: 2, 3>, scalar_prefetch = 0 : i64, scratch_operands = 1 : i64, tpu.core_type = #tpu.core_type<tc>, window_params = [{pipeline_mode = #tpu.pipeline_mode<synchronous>, transform_indices = @transform_0, window_bounds = array<i64: 9, 4, 1, 1>}, {pipeline_mode = #tpu.pipeline_mode<synchronous>, transform_indices = @transform_1, window_bounds = array<i64: 4, 1, 1>}, {pipeline_mode = #tpu.pipeline_mode<synchronous>, transform_indices = @transform_2, window_bounds = array<i64: 11, 4, 1, 1>}, {pipeline_mode = #tpu.pipeline_mode<synchronous>, transform_indices = @transform_3, window_bounds = array<i64: 4, 1, 1>}, {pipeline_mode = #tpu.pipeline_mode<synchronous>, transform_indices = @transform_4, window_bounds = array<i64: 11, 4, 1, 1>}, {pipeline_mode = #tpu.pipeline_mode<synchronous>, transform_indices = @transform_5, window_bounds = array<i64: 4, 1, 1>}, {transform_indices = @transform_6, window_bounds = array<i64: 1, 4, 16, 16>}, {transform_indices = @transform_7, window_bounds = array<i64: 1, 4, 16, 16>}]} {
    %cst = arith.constant 0.000000e+00 : f32
    %0 = vector.broadcast %cst : f32 to vector<4x26x26xf32>
    %c0 = arith.constant 0 : index
    %c0_0 = arith.constant 0 : index
    %c0_1 = arith.constant 0 : index
    %1 = vector.load %arg10[%c0, %c0_0, %c0_1] : memref<4x26x26xf32, #tpu.memory_space<vmem>>, vector<4x26x26xf32>
    tpu.vector_store %arg10[%c0, %c0_0, %c0_1], %0 {strides = array<i32>} : memref<4x26x26xf32, #tpu.memory_space<vmem>>, vector<4x26x26xf32>,
    %c0_2 = arith.constant 0 : index
    %c0_3 = arith.constant 0 : index
    %c0_4 = arith.constant 0 : index
    %c0_5 = arith.constant 0 : index
    %2 = vector.load %arg8[%c0_2, %c0_3, %c0_4, %c0_5] : memref<1x4x16x16xf32, #tpu.memory_space<vmem>>, vector<1x4x16x16xf32>
    %3 = vector.shape_cast %2 : vector<1x4x16x16xf32> to vector<4x16x16xf32>
    %c0_6 = arith.constant 0 : index
    %c5 = arith.constant 5 : index
    %c5_7 = arith.constant 5 : index
    %4 = vector.load %arg10[%c0_6, %c5, %c5_7] : memref<4x26x26xf32, #tpu.memory_space<vmem>>, vector<4x16x16xf32>
    tpu.vector_store %arg10[%c0_6, %c5, %c5_7], %3 {strides = array<i32>} : memref<4x26x26xf32, #tpu.memory_space<vmem>>, vector<4x16x16xf32>,
    %c0_i32 = arith.constant 0 : i32
    %5 = arith.cmpi eq, %arg1, %c0_i32 : i32
    %6 = arith.extui %5 : i1 to i32
    %c0_i32_8 = arith.constant 0 : i32
    %7 = arith.cmpi ne, %6, %c0_i32_8 : i32
    scf.if %7 {
      %cst_11 = arith.constant 0.000000e+00 : f32
      %14 = vector.broadcast %cst_11 : f32 to vector<4x16x16xf32>
      %c0_12 = arith.constant 0 : index
      %c4 = arith.constant 4 : index
      %c4_13 = arith.constant 4 : index
      %15 = vector.load %arg10[%c0_12, %c4, %c4_13] : memref<4x26x26xf32, #tpu.memory_space<vmem>>, vector<4x16x16xf32>
      %c0_14 = arith.constant 0 : index
      %c0_15 = arith.constant 0 : index
      %c0_16 = arith.constant 0 : index
      %c0_17 = arith.constant 0 : index
      %16 = vector.load %arg2[%c0_14, %c0_15, %c0_16, %c0_17] : memref<9x4x1x1xf32, #tpu.memory_space<vmem>>, vector<1x4x1x1xf32>
      %17 = vector.shape_cast %16 : vector<1x4x1x1xf32> to vector<4x1x1xf32>
      %18 = vector.broadcast %17 : vector<4x1x1xf32> to vector<4x16x16xf32>
      %19 = arith.mulf %15, %18 : vector<4x16x16xf32>
      %20 = arith.addf %14, %19 : vector<4x16x16xf32>
      %c0_18 = arith.constant 0 : index
      %c4_19 = arith.constant 4 : index
      %c5_20 = arith.constant 5 : index
      %21 = vector.load %arg10[%c0_18, %c4_19, %c5_20] : memref<4x26x26xf32, #tpu.memory_space<vmem>>, vector<4x16x16xf32>
      %c1 = arith.constant 1 : index
      %c0_21 = arith.constant 0 : index
      %c0_22 = arith.constant 0 : index
      %c0_23 = arith.constant 0 : index
      %22 = vector.load %arg2[%c1, %c0_21, %c0_22, %c0_23] : memref<9x4x1x1xf32, #tpu.memory_space<vmem>>, vector<1x4x1x1xf32>
      %23 = vector.shape_cast %22 : vector<1x4x1x1xf32> to vector<4x1x1xf32>
      %24 = vector.broadcast %23 : vector<4x1x1xf32> to vector<4x16x16xf32>
      %25 = arith.mulf %21, %24 : vector<4x16x16xf32>
      %26 = arith.addf %20, %25 : vector<4x16x16xf32>
      %c0_24 = arith.constant 0 : index
      %c4_25 = arith.constant 4 : index
      %c6 = arith.constant 6 : index
      %27 = vector.load %arg10[%c0_24, %c4_25, %c6] : memref<4x26x26xf32, #tpu.memory_space<vmem>>, vector<4x16x16xf32>
      %c2 = arith.constant 2 : index
      %c0_26 = arith.constant 0 : index
      %c0_27 = arith.constant 0 : index
      %c0_28 = arith.constant 0 : index
      %28 = vector.load %arg2[%c2, %c0_26, %c0_27, %c0_28] : memref<9x4x1x1xf32, #tpu.memory_space<vmem>>, vector<1x4x1x1xf32>
      %29 = vector.shape_cast %28 : vector<1x4x1x1xf32> to vector<4x1x1xf32>
      %30 = vector.broadcast %29 : vector<4x1x1xf32> to vector<4x16x16xf32>
      %31 = arith.mulf %27, %30 : vector<4x16x16xf32>
      %32 = arith.addf %26, %31 : vector<4x16x16xf32>
      %c0_29 = arith.constant 0 : index
      %c5_30 = arith.constant 5 : index
      %c4_31 = arith.constant 4 : index
      %33 = vector.load %arg10[%c0_29, %c5_30, %c4_31] : memref<4x26x26xf32, #tpu.memory_space<vmem>>, vector<4x16x16xf32>
      %c3 = arith.constant 3 : index
      %c0_32 = arith.constant 0 : index
      %c0_33 = arith.constant 0 : index
      %c0_34 = arith.constant 0 : index
      %34 = vector.load %arg2[%c3, %c0_32, %c0_33, %c0_34] : memref<9x4x1x1xf32, #tpu.memory_space<vmem>>, vector<1x4x1x1xf32>
      %35 = vector.shape_cast %34 : vector<1x4x1x1xf32> to vector<4x1x1xf32>
      %36 = vector.broadcast %35 : vector<4x1x1xf32> to vector<4x16x16xf32>
      %37 = arith.mulf %33, %36 : vector<4x16x16xf32>
      %38 = arith.addf %32, %37 : vector<4x16x16xf32>
      %c0_35 = arith.constant 0 : index
      %c5_36 = arith.constant 5 : index
      %c5_37 = arith.constant 5 : index
      %39 = vector.load %arg10[%c0_35, %c5_36, %c5_37] : memref<4x26x26xf32, #tpu.memory_space<vmem>>, vector<4x16x16xf32>
      %c4_38 = arith.constant 4 : index
      %c0_39 = arith.constant 0 : index
      %c0_40 = arith.constant 0 : index
      %c0_41 = arith.constant 0 : index
      %40 = vector.load %arg2[%c4_38, %c0_39, %c0_40, %c0_41] : memref<9x4x1x1xf32, #tpu.memory_space<vmem>>, vector<1x4x1x1xf32>
      %41 = vector.shape_cast %40 : vector<1x4x1x1xf32> to vector<4x1x1xf32>
      %42 = vector.broadcast %41 : vector<4x1x1xf32> to vector<4x16x16xf32>
      %43 = arith.mulf %39, %42 : vector<4x16x16xf32>
      %44 = arith.addf %38, %43 : vector<4x16x16xf32>
      %c0_42 = arith.constant 0 : index
      %c5_43 = arith.constant 5 : index
      %c6_44 = arith.constant 6 : index
      %45 = vector.load %arg10[%c0_42, %c5_43, %c6_44] : memref<4x26x26xf32, #tpu.memory_space<vmem>>, vector<4x16x16xf32>
      %c5_45 = arith.constant 5 : index
      %c0_46 = arith.constant 0 : index
      %c0_47 = arith.constant 0 : index
      %c0_48 = arith.constant 0 : index
      %46 = vector.load %arg2[%c5_45, %c0_46, %c0_47, %c0_48] : memref<9x4x1x1xf32, #tpu.memory_space<vmem>>, vector<1x4x1x1xf32>
      %47 = vector.shape_cast %46 : vector<1x4x1x1xf32> to vector<4x1x1xf32>
      %48 = vector.broadcast %47 : vector<4x1x1xf32> to vector<4x16x16xf32>
      %49 = arith.mulf %45, %48 : vector<4x16x16xf32>
      %50 = arith.addf %44, %49 : vector<4x16x16xf32>
      %c0_49 = arith.constant 0 : index
      %c6_50 = arith.constant 6 : index
      %c4_51 = arith.constant 4 : index
      %51 = vector.load %arg10[%c0_49, %c6_50, %c4_51] : memref<4x26x26xf32, #tpu.memory_space<vmem>>, vector<4x16x16xf32>
      %c6_52 = arith.constant 6 : index
      %c0_53 = arith.constant 0 : index
      %c0_54 = arith.constant 0 : index
      %c0_55 = arith.constant 0 : index
      %52 = vector.load %arg2[%c6_52, %c0_53, %c0_54, %c0_55] : memref<9x4x1x1xf32, #tpu.memory_space<vmem>>, vector<1x4x1x1xf32>
      %53 = vector.shape_cast %52 : vector<1x4x1x1xf32> to vector<4x1x1xf32>
      %54 = vector.broadcast %53 : vector<4x1x1xf32> to vector<4x16x16xf32>
      %55 = arith.mulf %51, %54 : vector<4x16x16xf32>
      %56 = arith.addf %50, %55 : vector<4x16x16xf32>
      %c0_56 = arith.constant 0 : index
      %c6_57 = arith.constant 6 : index
      %c5_58 = arith.constant 5 : index
      %57 = vector.load %arg10[%c0_56, %c6_57, %c5_58] : memref<4x26x26xf32, #tpu.memory_space<vmem>>, vector<4x16x16xf32>
      %c7 = arith.constant 7 : index
      %c0_59 = arith.constant 0 : index
      %c0_60 = arith.constant 0 : index
      %c0_61 = arith.constant 0 : index
      %58 = vector.load %arg2[%c7, %c0_59, %c0_60, %c0_61] : memref<9x4x1x1xf32, #tpu.memory_space<vmem>>, vector<1x4x1x1xf32>
      %59 = vector.shape_cast %58 : vector<1x4x1x1xf32> to vector<4x1x1xf32>
      %60 = vector.broadcast %59 : vector<4x1x1xf32> to vector<4x16x16xf32>
      %61 = arith.mulf %57, %60 : vector<4x16x16xf32>
      %62 = arith.addf %56, %61 : vector<4x16x16xf32>
      %c0_62 = arith.constant 0 : index
      %c6_63 = arith.constant 6 : index
      %c6_64 = arith.constant 6 : index
      %63 = vector.load %arg10[%c0_62, %c6_63, %c6_64] : memref<4x26x26xf32, #tpu.memory_space<vmem>>, vector<4x16x16xf32>
      %c8 = arith.constant 8 : index
      %c0_65 = arith.constant 0 : index
      %c0_66 = arith.constant 0 : index
      %c0_67 = arith.constant 0 : index
      %64 = vector.load %arg2[%c8, %c0_65, %c0_66, %c0_67] : memref<9x4x1x1xf32, #tpu.memory_space<vmem>>, vector<1x4x1x1xf32>
      %65 = vector.shape_cast %64 : vector<1x4x1x1xf32> to vector<4x1x1xf32>
      %66 = vector.broadcast %65 : vector<4x1x1xf32> to vector<4x16x16xf32>
      %67 = arith.mulf %63, %66 : vector<4x16x16xf32>
      %68 = arith.addf %62, %67 : vector<4x16x16xf32>
      %c0_68 = arith.constant 0 : index
      %c0_69 = arith.constant 0 : index
      %c0_70 = arith.constant 0 : index
      %69 = vector.load %arg3[%c0_68, %c0_69, %c0_70] : memref<4x1x1xf32, #tpu.memory_space<vmem>>, vector<4x1x1xf32>
      %70 = vector.broadcast %69 : vector<4x1x1xf32> to vector<4x16x16xf32>
      %71 = arith.addf %68, %70 : vector<4x16x16xf32>
      %c0_71 = arith.constant 0 : index
      %c0_72 = arith.constant 0 : index
      %c0_73 = arith.constant 0 : index
      %c0_74 = arith.constant 0 : index
      %72 = vector.load %arg9[%c0_71, %c0_72, %c0_73, %c0_74] : memref<1x4x16x16xf32, #tpu.memory_space<vmem>>, vector<1x4x16x16xf32>
      %73 = vector.shape_cast %72 : vector<1x4x16x16xf32> to vector<4x16x16xf32>
      %74 = vector.shape_cast %71 : vector<4x16x16xf32> to vector<1x4x16x16xf32>
      tpu.vector_store %arg9[%c0_71, %c0_72, %c0_73, %c0_74], %74 {strides = array<i32>} : memref<1x4x16x16xf32, #tpu.memory_space<vmem>>, vector<1x4x16x16xf32>,
    } else {
    }
    %c1_i32 = arith.constant 1 : i32
    %8 = arith.cmpi eq, %arg1, %c1_i32 : i32
    %9 = arith.extui %8 : i1 to i32
    %c0_i32_9 = arith.constant 0 : i32
    %10 = arith.cmpi ne, %9, %c0_i32_9 : i32
    scf.if %10 {
      %cst_11 = arith.constant 0.000000e+00 : f32
      %14 = vector.broadcast %cst_11 : f32 to vector<4x16x16xf32>
      %c0_12 = arith.constant 0 : index
      %c5_13 = arith.constant 5 : index
      %c0_14 = arith.constant 0 : index
      %15 = vector.load %arg10[%c0_12, %c5_13, %c0_14] : memref<4x26x26xf32, #tpu.memory_space<vmem>>, vector<4x16x16xf32>
      %c0_15 = arith.constant 0 : index
      %c0_16 = arith.constant 0 : index
      %c0_17 = arith.constant 0 : index
      %c0_18 = arith.constant 0 : index
      %16 = vector.load %arg4[%c0_15, %c0_16, %c0_17, %c0_18] : memref<11x4x1x1xf32, #tpu.memory_space<vmem>>, vector<1x4x1x1xf32>
      %17 = vector.shape_cast %16 : vector<1x4x1x1xf32> to vector<4x1x1xf32>
      %18 = vector.broadcast %17 : vector<4x1x1xf32> to vector<4x16x16xf32>
      %19 = arith.mulf %15, %18 : vector<4x16x16xf32>
      %20 = arith.addf %14, %19 : vector<4x16x16xf32>
      %c0_19 = arith.constant 0 : index
      %c5_20 = arith.constant 5 : index
      %c1 = arith.constant 1 : index
      %21 = vector.load %arg10[%c0_19, %c5_20, %c1] : memref<4x26x26xf32, #tpu.memory_space<vmem>>, vector<4x16x16xf32>
      %c1_21 = arith.constant 1 : index
      %c0_22 = arith.constant 0 : index
      %c0_23 = arith.constant 0 : index
      %c0_24 = arith.constant 0 : index
      %22 = vector.load %arg4[%c1_21, %c0_22, %c0_23, %c0_24] : memref<11x4x1x1xf32, #tpu.memory_space<vmem>>, vector<1x4x1x1xf32>
      %23 = vector.shape_cast %22 : vector<1x4x1x1xf32> to vector<4x1x1xf32>
      %24 = vector.broadcast %23 : vector<4x1x1xf32> to vector<4x16x16xf32>
      %25 = arith.mulf %21, %24 : vector<4x16x16xf32>
      %26 = arith.addf %20, %25 : vector<4x16x16xf32>
      %c0_25 = arith.constant 0 : index
      %c5_26 = arith.constant 5 : index
      %c2 = arith.constant 2 : index
      %27 = vector.load %arg10[%c0_25, %c5_26, %c2] : memref<4x26x26xf32, #tpu.memory_space<vmem>>, vector<4x16x16xf32>
      %c2_27 = arith.constant 2 : index
      %c0_28 = arith.constant 0 : index
      %c0_29 = arith.constant 0 : index
      %c0_30 = arith.constant 0 : index
      %28 = vector.load %arg4[%c2_27, %c0_28, %c0_29, %c0_30] : memref<11x4x1x1xf32, #tpu.memory_space<vmem>>, vector<1x4x1x1xf32>
      %29 = vector.shape_cast %28 : vector<1x4x1x1xf32> to vector<4x1x1xf32>
      %30 = vector.broadcast %29 : vector<4x1x1xf32> to vector<4x16x16xf32>
      %31 = arith.mulf %27, %30 : vector<4x16x16xf32>
      %32 = arith.addf %26, %31 : vector<4x16x16xf32>
      %c0_31 = arith.constant 0 : index
      %c5_32 = arith.constant 5 : index
      %c3 = arith.constant 3 : index
      %33 = vector.load %arg10[%c0_31, %c5_32, %c3] : memref<4x26x26xf32, #tpu.memory_space<vmem>>, vector<4x16x16xf32>
      %c3_33 = arith.constant 3 : index
      %c0_34 = arith.constant 0 : index
      %c0_35 = arith.constant 0 : index
      %c0_36 = arith.constant 0 : index
      %34 = vector.load %arg4[%c3_33, %c0_34, %c0_35, %c0_36] : memref<11x4x1x1xf32, #tpu.memory_space<vmem>>, vector<1x4x1x1xf32>
      %35 = vector.shape_cast %34 : vector<1x4x1x1xf32> to vector<4x1x1xf32>
      %36 = vector.broadcast %35 : vector<4x1x1xf32> to vector<4x16x16xf32>
      %37 = arith.mulf %33, %36 : vector<4x16x16xf32>
      %38 = arith.addf %32, %37 : vector<4x16x16xf32>
      %c0_37 = arith.constant 0 : index
      %c5_38 = arith.constant 5 : index
      %c4 = arith.constant 4 : index
      %39 = vector.load %arg10[%c0_37, %c5_38, %c4] : memref<4x26x26xf32, #tpu.memory_space<vmem>>, vector<4x16x16xf32>
      %c4_39 = arith.constant 4 : index
      %c0_40 = arith.constant 0 : index
      %c0_41 = arith.constant 0 : index
      %c0_42 = arith.constant 0 : index
      %40 = vector.load %arg4[%c4_39, %c0_40, %c0_41, %c0_42] : memref<11x4x1x1xf32, #tpu.memory_space<vmem>>, vector<1x4x1x1xf32>
      %41 = vector.shape_cast %40 : vector<1x4x1x1xf32> to vector<4x1x1xf32>
      %42 = vector.broadcast %41 : vector<4x1x1xf32> to vector<4x16x16xf32>
      %43 = arith.mulf %39, %42 : vector<4x16x16xf32>
      %44 = arith.addf %38, %43 : vector<4x16x16xf32>
      %c0_43 = arith.constant 0 : index
      %c5_44 = arith.constant 5 : index
      %c5_45 = arith.constant 5 : index
      %45 = vector.load %arg10[%c0_43, %c5_44, %c5_45] : memref<4x26x26xf32, #tpu.memory_space<vmem>>, vector<4x16x16xf32>
      %c5_46 = arith.constant 5 : index
      %c0_47 = arith.constant 0 : index
      %c0_48 = arith.constant 0 : index
      %c0_49 = arith.constant 0 : index
      %46 = vector.load %arg4[%c5_46, %c0_47, %c0_48, %c0_49] : memref<11x4x1x1xf32, #tpu.memory_space<vmem>>, vector<1x4x1x1xf32>
      %47 = vector.shape_cast %46 : vector<1x4x1x1xf32> to vector<4x1x1xf32>
      %48 = vector.broadcast %47 : vector<4x1x1xf32> to vector<4x16x16xf32>
      %49 = arith.mulf %45, %48 : vector<4x16x16xf32>
      %50 = arith.addf %44, %49 : vector<4x16x16xf32>
      %c0_50 = arith.constant 0 : index
      %c5_51 = arith.constant 5 : index
      %c6 = arith.constant 6 : index
      %51 = vector.load %arg10[%c0_50, %c5_51, %c6] : memref<4x26x26xf32, #tpu.memory_space<vmem>>, vector<4x16x16xf32>
      %c6_52 = arith.constant 6 : index
      %c0_53 = arith.constant 0 : index
      %c0_54 = arith.constant 0 : index
      %c0_55 = arith.constant 0 : index
      %52 = vector.load %arg4[%c6_52, %c0_53, %c0_54, %c0_55] : memref<11x4x1x1xf32, #tpu.memory_space<vmem>>, vector<1x4x1x1xf32>
      %53 = vector.shape_cast %52 : vector<1x4x1x1xf32> to vector<4x1x1xf32>
      %54 = vector.broadcast %53 : vector<4x1x1xf32> to vector<4x16x16xf32>
      %55 = arith.mulf %51, %54 : vector<4x16x16xf32>
      %56 = arith.addf %50, %55 : vector<4x16x16xf32>
      %c0_56 = arith.constant 0 : index
      %c5_57 = arith.constant 5 : index
      %c7 = arith.constant 7 : index
      %57 = vector.load %arg10[%c0_56, %c5_57, %c7] : memref<4x26x26xf32, #tpu.memory_space<vmem>>, vector<4x16x16xf32>
      %c7_58 = arith.constant 7 : index
      %c0_59 = arith.constant 0 : index
      %c0_60 = arith.constant 0 : index
      %c0_61 = arith.constant 0 : index
      %58 = vector.load %arg4[%c7_58, %c0_59, %c0_60, %c0_61] : memref<11x4x1x1xf32, #tpu.memory_space<vmem>>, vector<1x4x1x1xf32>
      %59 = vector.shape_cast %58 : vector<1x4x1x1xf32> to vector<4x1x1xf32>
      %60 = vector.broadcast %59 : vector<4x1x1xf32> to vector<4x16x16xf32>
      %61 = arith.mulf %57, %60 : vector<4x16x16xf32>
      %62 = arith.addf %56, %61 : vector<4x16x16xf32>
      %c0_62 = arith.constant 0 : index
      %c5_63 = arith.constant 5 : index
      %c8 = arith.constant 8 : index
      %63 = vector.load %arg10[%c0_62, %c5_63, %c8] : memref<4x26x26xf32, #tpu.memory_space<vmem>>, vector<4x16x16xf32>
      %c8_64 = arith.constant 8 : index
      %c0_65 = arith.constant 0 : index
      %c0_66 = arith.constant 0 : index
      %c0_67 = arith.constant 0 : index
      %64 = vector.load %arg4[%c8_64, %c0_65, %c0_66, %c0_67] : memref<11x4x1x1xf32, #tpu.memory_space<vmem>>, vector<1x4x1x1xf32>
      %65 = vector.shape_cast %64 : vector<1x4x1x1xf32> to vector<4x1x1xf32>
      %66 = vector.broadcast %65 : vector<4x1x1xf32> to vector<4x16x16xf32>
      %67 = arith.mulf %63, %66 : vector<4x16x16xf32>
      %68 = arith.addf %62, %67 : vector<4x16x16xf32>
      %c0_68 = arith.constant 0 : index
      %c5_69 = arith.constant 5 : index
      %c9 = arith.constant 9 : index
      %69 = vector.load %arg10[%c0_68, %c5_69, %c9] : memref<4x26x26xf32, #tpu.memory_space<vmem>>, vector<4x16x16xf32>
      %c9_70 = arith.constant 9 : index
      %c0_71 = arith.constant 0 : index
      %c0_72 = arith.constant 0 : index
      %c0_73 = arith.constant 0 : index
      %70 = vector.load %arg4[%c9_70, %c0_71, %c0_72, %c0_73] : memref<11x4x1x1xf32, #tpu.memory_space<vmem>>, vector<1x4x1x1xf32>
      %71 = vector.shape_cast %70 : vector<1x4x1x1xf32> to vector<4x1x1xf32>
      %72 = vector.broadcast %71 : vector<4x1x1xf32> to vector<4x16x16xf32>
      %73 = arith.mulf %69, %72 : vector<4x16x16xf32>
      %74 = arith.addf %68, %73 : vector<4x16x16xf32>
      %c0_74 = arith.constant 0 : index
      %c5_75 = arith.constant 5 : index
      %c10 = arith.constant 10 : index
      %75 = vector.load %arg10[%c0_74, %c5_75, %c10] : memref<4x26x26xf32, #tpu.memory_space<vmem>>, vector<4x16x16xf32>
      %c10_76 = arith.constant 10 : index
      %c0_77 = arith.constant 0 : index
      %c0_78 = arith.constant 0 : index
      %c0_79 = arith.constant 0 : index
      %76 = vector.load %arg4[%c10_76, %c0_77, %c0_78, %c0_79] : memref<11x4x1x1xf32, #tpu.memory_space<vmem>>, vector<1x4x1x1xf32>
      %77 = vector.shape_cast %76 : vector<1x4x1x1xf32> to vector<4x1x1xf32>
      %78 = vector.broadcast %77 : vector<4x1x1xf32> to vector<4x16x16xf32>
      %79 = arith.mulf %75, %78 : vector<4x16x16xf32>
      %80 = arith.addf %74, %79 : vector<4x16x16xf32>
      %c0_80 = arith.constant 0 : index
      %c0_81 = arith.constant 0 : index
      %c0_82 = arith.constant 0 : index
      %81 = vector.load %arg5[%c0_80, %c0_81, %c0_82] : memref<4x1x1xf32, #tpu.memory_space<vmem>>, vector<4x1x1xf32>
      %82 = vector.broadcast %81 : vector<4x1x1xf32> to vector<4x16x16xf32>
      %83 = arith.addf %80, %82 : vector<4x16x16xf32>
      %c0_83 = arith.constant 0 : index
      %c0_84 = arith.constant 0 : index
      %c0_85 = arith.constant 0 : index
      %c0_86 = arith.constant 0 : index
      %84 = vector.load %arg9[%c0_83, %c0_84, %c0_85, %c0_86] : memref<1x4x16x16xf32, #tpu.memory_space<vmem>>, vector<1x4x16x16xf32>
      %85 = vector.shape_cast %84 : vector<1x4x16x16xf32> to vector<4x16x16xf32>
      %86 = vector.shape_cast %83 : vector<4x16x16xf32> to vector<1x4x16x16xf32>
      tpu.vector_store %arg9[%c0_83, %c0_84, %c0_85, %c0_86], %86 {strides = array<i32>} : memref<1x4x16x16xf32, #tpu.memory_space<vmem>>, vector<1x4x16x16xf32>,
    } else {
    }
    %c2_i32 = arith.constant 2 : i32
    %11 = arith.cmpi eq, %arg1, %c2_i32 : i32
    %12 = arith.extui %11 : i1 to i32
    %c0_i32_10 = arith.constant 0 : i32
    %13 = arith.cmpi ne, %12, %c0_i32_10 : i32
    scf.if %13 {
      %cst_11 = arith.constant 0.000000e+00 : f32
      %14 = vector.broadcast %cst_11 : f32 to vector<4x16x16xf32>
      %c0_12 = arith.constant 0 : index
      %c0_13 = arith.constant 0 : index
      %c5_14 = arith.constant 5 : index
      %15 = vector.load %arg10[%c0_12, %c0_13, %c5_14] : memref<4x26x26xf32, #tpu.memory_space<vmem>>, vector<4x16x16xf32>
      %c0_15 = arith.constant 0 : index
      %c0_16 = arith.constant 0 : index
      %c0_17 = arith.constant 0 : index
      %c0_18 = arith.constant 0 : index
      %16 = vector.load %arg6[%c0_15, %c0_16, %c0_17, %c0_18] : memref<11x4x1x1xf32, #tpu.memory_space<vmem>>, vector<1x4x1x1xf32>
      %17 = vector.shape_cast %16 : vector<1x4x1x1xf32> to vector<4x1x1xf32>
      %18 = vector.broadcast %17 : vector<4x1x1xf32> to vector<4x16x16xf32>
      %19 = arith.mulf %15, %18 : vector<4x16x16xf32>
      %20 = arith.addf %14, %19 : vector<4x16x16xf32>
      %c0_19 = arith.constant 0 : index
      %c1 = arith.constant 1 : index
      %c5_20 = arith.constant 5 : index
      %21 = vector.load %arg10[%c0_19, %c1, %c5_20] : memref<4x26x26xf32, #tpu.memory_space<vmem>>, vector<4x16x16xf32>
      %c1_21 = arith.constant 1 : index
      %c0_22 = arith.constant 0 : index
      %c0_23 = arith.constant 0 : index
      %c0_24 = arith.constant 0 : index
      %22 = vector.load %arg6[%c1_21, %c0_22, %c0_23, %c0_24] : memref<11x4x1x1xf32, #tpu.memory_space<vmem>>, vector<1x4x1x1xf32>
      %23 = vector.shape_cast %22 : vector<1x4x1x1xf32> to vector<4x1x1xf32>
      %24 = vector.broadcast %23 : vector<4x1x1xf32> to vector<4x16x16xf32>
      %25 = arith.mulf %21, %24 : vector<4x16x16xf32>
      %26 = arith.addf %20, %25 : vector<4x16x16xf32>
      %c0_25 = arith.constant 0 : index
      %c2 = arith.constant 2 : index
      %c5_26 = arith.constant 5 : index
      %27 = vector.load %arg10[%c0_25, %c2, %c5_26] : memref<4x26x26xf32, #tpu.memory_space<vmem>>, vector<4x16x16xf32>
      %c2_27 = arith.constant 2 : index
      %c0_28 = arith.constant 0 : index
      %c0_29 = arith.constant 0 : index
      %c0_30 = arith.constant 0 : index
      %28 = vector.load %arg6[%c2_27, %c0_28, %c0_29, %c0_30] : memref<11x4x1x1xf32, #tpu.memory_space<vmem>>, vector<1x4x1x1xf32>
      %29 = vector.shape_cast %28 : vector<1x4x1x1xf32> to vector<4x1x1xf32>
      %30 = vector.broadcast %29 : vector<4x1x1xf32> to vector<4x16x16xf32>
      %31 = arith.mulf %27, %30 : vector<4x16x16xf32>
      %32 = arith.addf %26, %31 : vector<4x16x16xf32>
      %c0_31 = arith.constant 0 : index
      %c3 = arith.constant 3 : index
      %c5_32 = arith.constant 5 : index
      %33 = vector.load %arg10[%c0_31, %c3, %c5_32] : memref<4x26x26xf32, #tpu.memory_space<vmem>>, vector<4x16x16xf32>
      %c3_33 = arith.constant 3 : index
      %c0_34 = arith.constant 0 : index
      %c0_35 = arith.constant 0 : index
      %c0_36 = arith.constant 0 : index
      %34 = vector.load %arg6[%c3_33, %c0_34, %c0_35, %c0_36] : memref<11x4x1x1xf32, #tpu.memory_space<vmem>>, vector<1x4x1x1xf32>
      %35 = vector.shape_cast %34 : vector<1x4x1x1xf32> to vector<4x1x1xf32>
      %36 = vector.broadcast %35 : vector<4x1x1xf32> to vector<4x16x16xf32>
      %37 = arith.mulf %33, %36 : vector<4x16x16xf32>
      %38 = arith.addf %32, %37 : vector<4x16x16xf32>
      %c0_37 = arith.constant 0 : index
      %c4 = arith.constant 4 : index
      %c5_38 = arith.constant 5 : index
      %39 = vector.load %arg10[%c0_37, %c4, %c5_38] : memref<4x26x26xf32, #tpu.memory_space<vmem>>, vector<4x16x16xf32>
      %c4_39 = arith.constant 4 : index
      %c0_40 = arith.constant 0 : index
      %c0_41 = arith.constant 0 : index
      %c0_42 = arith.constant 0 : index
      %40 = vector.load %arg6[%c4_39, %c0_40, %c0_41, %c0_42] : memref<11x4x1x1xf32, #tpu.memory_space<vmem>>, vector<1x4x1x1xf32>
      %41 = vector.shape_cast %40 : vector<1x4x1x1xf32> to vector<4x1x1xf32>
      %42 = vector.broadcast %41 : vector<4x1x1xf32> to vector<4x16x16xf32>
      %43 = arith.mulf %39, %42 : vector<4x16x16xf32>
      %44 = arith.addf %38, %43 : vector<4x16x16xf32>
      %c0_43 = arith.constant 0 : index
      %c5_44 = arith.constant 5 : index
      %c5_45 = arith.constant 5 : index
      %45 = vector.load %arg10[%c0_43, %c5_44, %c5_45] : memref<4x26x26xf32, #tpu.memory_space<vmem>>, vector<4x16x16xf32>
      %c5_46 = arith.constant 5 : index
      %c0_47 = arith.constant 0 : index
      %c0_48 = arith.constant 0 : index
      %c0_49 = arith.constant 0 : index
      %46 = vector.load %arg6[%c5_46, %c0_47, %c0_48, %c0_49] : memref<11x4x1x1xf32, #tpu.memory_space<vmem>>, vector<1x4x1x1xf32>
      %47 = vector.shape_cast %46 : vector<1x4x1x1xf32> to vector<4x1x1xf32>
      %48 = vector.broadcast %47 : vector<4x1x1xf32> to vector<4x16x16xf32>
      %49 = arith.mulf %45, %48 : vector<4x16x16xf32>
      %50 = arith.addf %44, %49 : vector<4x16x16xf32>
      %c0_50 = arith.constant 0 : index
      %c6 = arith.constant 6 : index
      %c5_51 = arith.constant 5 : index
      %51 = vector.load %arg10[%c0_50, %c6, %c5_51] : memref<4x26x26xf32, #tpu.memory_space<vmem>>, vector<4x16x16xf32>
      %c6_52 = arith.constant 6 : index
      %c0_53 = arith.constant 0 : index
      %c0_54 = arith.constant 0 : index
      %c0_55 = arith.constant 0 : index
      %52 = vector.load %arg6[%c6_52, %c0_53, %c0_54, %c0_55] : memref<11x4x1x1xf32, #tpu.memory_space<vmem>>, vector<1x4x1x1xf32>
      %53 = vector.shape_cast %52 : vector<1x4x1x1xf32> to vector<4x1x1xf32>
      %54 = vector.broadcast %53 : vector<4x1x1xf32> to vector<4x16x16xf32>
      %55 = arith.mulf %51, %54 : vector<4x16x16xf32>
      %56 = arith.addf %50, %55 : vector<4x16x16xf32>
      %c0_56 = arith.constant 0 : index
      %c7 = arith.constant 7 : index
      %c5_57 = arith.constant 5 : index
      %57 = vector.load %arg10[%c0_56, %c7, %c5_57] : memref<4x26x26xf32, #tpu.memory_space<vmem>>, vector<4x16x16xf32>
      %c7_58 = arith.constant 7 : index
      %c0_59 = arith.constant 0 : index
      %c0_60 = arith.constant 0 : index
      %c0_61 = arith.constant 0 : index
      %58 = vector.load %arg6[%c7_58, %c0_59, %c0_60, %c0_61] : memref<11x4x1x1xf32, #tpu.memory_space<vmem>>, vector<1x4x1x1xf32>
      %59 = vector.shape_cast %58 : vector<1x4x1x1xf32> to vector<4x1x1xf32>
      %60 = vector.broadcast %59 : vector<4x1x1xf32> to vector<4x16x16xf32>
      %61 = arith.mulf %57, %60 : vector<4x16x16xf32>
      %62 = arith.addf %56, %61 : vector<4x16x16xf32>
      %c0_62 = arith.constant 0 : index
      %c8 = arith.constant 8 : index
      %c5_63 = arith.constant 5 : index
      %63 = vector.load %arg10[%c0_62, %c8, %c5_63] : memref<4x26x26xf32, #tpu.memory_space<vmem>>, vector<4x16x16xf32>
      %c8_64 = arith.constant 8 : index
      %c0_65 = arith.constant 0 : index
      %c0_66 = arith.constant 0 : index
      %c0_67 = arith.constant 0 : index
      %64 = vector.load %arg6[%c8_64, %c0_65, %c0_66, %c0_67] : memref<11x4x1x1xf32, #tpu.memory_space<vmem>>, vector<1x4x1x1xf32>
      %65 = vector.shape_cast %64 : vector<1x4x1x1xf32> to vector<4x1x1xf32>
      %66 = vector.broadcast %65 : vector<4x1x1xf32> to vector<4x16x16xf32>
      %67 = arith.mulf %63, %66 : vector<4x16x16xf32>
      %68 = arith.addf %62, %67 : vector<4x16x16xf32>
      %c0_68 = arith.constant 0 : index
      %c9 = arith.constant 9 : index
      %c5_69 = arith.constant 5 : index
      %69 = vector.load %arg10[%c0_68, %c9, %c5_69] : memref<4x26x26xf32, #tpu.memory_space<vmem>>, vector<4x16x16xf32>
      %c9_70 = arith.constant 9 : index
      %c0_71 = arith.constant 0 : index
      %c0_72 = arith.constant 0 : index
      %c0_73 = arith.constant 0 : index
      %70 = vector.load %arg6[%c9_70, %c0_71, %c0_72, %c0_73] : memref<11x4x1x1xf32, #tpu.memory_space<vmem>>, vector<1x4x1x1xf32>
      %71 = vector.shape_cast %70 : vector<1x4x1x1xf32> to vector<4x1x1xf32>
      %72 = vector.broadcast %71 : vector<4x1x1xf32> to vector<4x16x16xf32>
      %73 = arith.mulf %69, %72 : vector<4x16x16xf32>
      %74 = arith.addf %68, %73 : vector<4x16x16xf32>
      %c0_74 = arith.constant 0 : index
      %c10 = arith.constant 10 : index
      %c5_75 = arith.constant 5 : index
      %75 = vector.load %arg10[%c0_74, %c10, %c5_75] : memref<4x26x26xf32, #tpu.memory_space<vmem>>, vector<4x16x16xf32>
      %c10_76 = arith.constant 10 : index
      %c0_77 = arith.constant 0 : index
      %c0_78 = arith.constant 0 : index
      %c0_79 = arith.constant 0 : index
      %76 = vector.load %arg6[%c10_76, %c0_77, %c0_78, %c0_79] : memref<11x4x1x1xf32, #tpu.memory_space<vmem>>, vector<1x4x1x1xf32>
      %77 = vector.shape_cast %76 : vector<1x4x1x1xf32> to vector<4x1x1xf32>
      %78 = vector.broadcast %77 : vector<4x1x1xf32> to vector<4x16x16xf32>
      %79 = arith.mulf %75, %78 : vector<4x16x16xf32>
      %80 = arith.addf %74, %79 : vector<4x16x16xf32>
      %c0_80 = arith.constant 0 : index
      %c0_81 = arith.constant 0 : index
      %c0_82 = arith.constant 0 : index
      %81 = vector.load %arg7[%c0_80, %c0_81, %c0_82] : memref<4x1x1xf32, #tpu.memory_space<vmem>>, vector<4x1x1xf32>
      %82 = vector.broadcast %81 : vector<4x1x1xf32> to vector<4x16x16xf32>
      %83 = arith.addf %80, %82 : vector<4x16x16xf32>
      %c0_83 = arith.constant 0 : index
      %c0_84 = arith.constant 0 : index
      %c0_85 = arith.constant 0 : index
      %c0_86 = arith.constant 0 : index
      %84 = vector.load %arg9[%c0_83, %c0_84, %c0_85, %c0_86] : memref<1x4x16x16xf32, #tpu.memory_space<vmem>>, vector<1x4x16x16xf32>
      %85 = vector.shape_cast %84 : vector<1x4x16x16xf32> to vector<4x16x16xf32>
      %86 = vector.shape_cast %83 : vector<4x16x16xf32> to vector<1x4x16x16xf32>
      tpu.vector_store %arg9[%c0_83, %c0_84, %c0_85, %c0_86], %86 {strides = array<i32>} : memref<1x4x16x16xf32, #tpu.memory_space<vmem>>, vector<1x4x16x16xf32>,
    } else {
    }
    return
  }
  func.func @transform_0(%arg0: i32, %arg1: i32) -> (i32, i32, i32, i32) {
    %c0_i32 = arith.constant 0 : i32
    %c0_i32_0 = arith.constant 0 : i32
    %c0_i32_1 = arith.constant 0 : i32
    %c0_i32_2 = arith.constant 0 : i32
    %c0_i32_3 = arith.constant 0 : i32
    return %c0_i32, %c0_i32_0, %c0_i32_1, %c0_i32_2 : i32, i32, i32, i32
  }
  func.func @transform_1(%arg0: i32, %arg1: i32) -> (i32, i32, i32) {
    %c0_i32 = arith.constant 0 : i32
    %c0_i32_0 = arith.constant 0 : i32
    %c0_i32_1 = arith.constant 0 : i32
    %c0_i32_2 = arith.constant 0 : i32
    return %c0_i32, %c0_i32_0, %c0_i32_1 : i32, i32, i32
  }
  func.func @transform_2(%arg0: i32, %arg1: i32) -> (i32, i32, i32, i32) {
    %c0_i32 = arith.constant 0 : i32
    %c0_i32_0 = arith.constant 0 : i32
    %c0_i32_1 = arith.constant 0 : i32
    %c0_i32_2 = arith.constant 0 : i32
    %c0_i32_3 = arith.constant 0 : i32
    return %c0_i32, %c0_i32_0, %c0_i32_1, %c0_i32_2 : i32, i32, i32, i32
  }
  func.func @transform_3(%arg0: i32, %arg1: i32) -> (i32, i32, i32) {
    %c0_i32 = arith.constant 0 : i32
    %c0_i32_0 = arith.constant 0 : i32
    %c0_i32_1 = arith.constant 0 : i32
    %c0_i32_2 = arith.constant 0 : i32
    return %c0_i32, %c0_i32_0, %c0_i32_1 : i32, i32, i32
  }
  func.func @transform_4(%arg0: i32, %arg1: i32) -> (i32, i32, i32, i32) {
    %c0_i32 = arith.constant 0 : i32
    %c0_i32_0 = arith.constant 0 : i32
    %c0_i32_1 = arith.constant 0 : i32
    %c0_i32_2 = arith.constant 0 : i32
    %c0_i32_3 = arith.constant 0 : i32
    return %c0_i32, %c0_i32_0, %c0_i32_1, %c0_i32_2 : i32, i32, i32, i32
  }
  func.func @transform_5(%arg0: i32, %arg1: i32) -> (i32, i32, i32) {
    %c0_i32 = arith.constant 0 : i32
    %c0_i32_0 = arith.constant 0 : i32
    %c0_i32_1 = arith.constant 0 : i32
    %c0_i32_2 = arith.constant 0 : i32
    return %c0_i32, %c0_i32_0, %c0_i32_1 : i32, i32, i32
  }
  func.func @transform_6(%arg0: i32, %arg1: i32) -> (i32, i32, i32, i32) {
    %c5_i32 = arith.constant 5 : i32
    %0 = arith.addi %c5_i32, %arg1 : i32
    %c0_i32 = arith.constant 0 : i32
    %c0_i32_0 = arith.constant 0 : i32
    %c0_i32_1 = arith.constant 0 : i32
    return %arg0, %0, %c0_i32, %c0_i32_0 : i32, i32, i32, i32
  }
  func.func @transform_7(%arg0: i32, %arg1: i32) -> (i32, i32, i32, i32) {
    %c5_i32 = arith.constant 5 : i32
    %0 = arith.addi %c5_i32, %arg1 : i32
    %c0_i32 = arith.constant 0 : i32
    %c0_i32_0 = arith.constant 0 : i32
    %c0_i32_1 = arith.constant 0 : i32
    return %arg0, %0, %c0_i32, %c0_i32_0 : i32, i32, i32, i32
  }
}

</mosaic_0001>

<bundles_post_ra>
// kernel: inception_dwconv2d_pallas.1
= control target key start
LH: loop header
LB: loop body
LE: loop exit
PB: predicated region body
PF: predicated region fallthrough
CT: control target
= control target key end

     0   :  { %s3176_s24 = smov 0   ;;  %s3178_s25 = smov 0   ;;  %s4169_s0 = inlined_call_operand.vmem [shape: f32[9,4,1,1], index: 0, kind: input, shape index: {}]   ;;  %s4170_s1 = inlined_call_operand.vmem [shape: f32[4,1,1], index: 1, kind: input, shape index: {}]   ;;  %s4171_s2 = inlined_call_operand.vmem [shape: f32[11,4,1,1], index: 2, kind: input, shape index: {}]   ;;  %s4172_s3 = inlined_call_operand.vmem [shape: f32[4,1,1], index: 3, kind: input, shape index: {}]   ;;  %s4173_s4 = inlined_call_operand.vmem [shape: f32[11,4,1,1], index: 4, kind: input, shape index: {}]   ;;  %s4174_s5 = inlined_call_operand.vmem [shape: f32[4,1,1], index: 5, kind: input, shape index: {}]   ;;  %s4175_s6 = inlined_call_operand.vmem [shape: f32[2,32,16,16], index: 6, kind: input, shape index: {}, may-alias: {6,7}]   ;;  %s4176_s7 = inlined_call_operand.vmem [shape: f32[2,32,16,16], index: 7, kind: output, shape index: {}, may-alias: {6,7}]  }
   0x1   :  { %s3180_s26 = smov 0   ;;  %s3182_s27 = smov 0  }
   0x2   :  { %s3184_s28 = smov 0  }
   0x3 LB: > { %s26_s29 = sadd.s32 1, %s3107_s26  ;;  %s29_s30 = sadd.s32 1, %s3111_s27  ;;  %s3115_s28 = sphi %s3184_s28, %s17_s28   ;;  %s3111_s27 = sphi %s3182_s27, %s4180_s27   ;;  %s3107_s26 = sphi %s3180_s26, %s4179_s26   ;;  %s3103_s25 = sphi %s3178_s25, %s4178_s25   ;;  %s3099_s24 = sphi %s3176_s24, %s4177_s24  }
   0x4   : > { %p27_p0 = scmp.ge.s32.totalorder %s26_s29, 3  ;;  %p2743_p1 = scmp.ge.s32.totalorder %s3115_s28, 1 }
   0x5   : > { %p265_p2 = scmp.lt.s32.totalorder %s3115_s28, 7 }
   0x6   : > { %s4182_s29 = smov (%p27_p0, %s26_s29), 0  ;;  %s4184_s30 = smov (!%p27_p0, %s29_s30), %s3111_s27 }
   0x7   : > { %p266_p3 = pnand %p2743_p1, %p265_p2  ;;  %p31_p4 = scmp.ge.s32.totalorder %s4184_s30, 2 }
   0x8   : > { %s2869_s8 = sshll.u32 (!%p266_p3), %s3099_s24, 2  ;;  %p311_p5 = scmp.lt.s32.totalorder (!%p266_p3), %s3103_s25, 1 }
   0x9   : > { %s4186_s30 = smov (%p31_p4, %s4184_s30), 0  ;;  %269 = sbr.rel (%p266_p3) target bundleno = 2306 (0x902), region = 48 }
   0xa   : > { %s2870_s9 = sadd.s32 (!%p266_p3), 20, %s2869_s8  ;;  %s3118_s20 = smov (!%p266_p3), 5  }
   0xb   : > { %p313_p6 = scmp.lt.s32.totalorder (!%p266_p3), %s2870_s9, 31  ;;  %p2752_p7 = scmp.ne.s32.totalorder (!%p266_p3), %s3099_s24, 0 }
   0xe   : > { %vm335_vm0 = vcmask 211968   ;;  %vm339_vm1 = vcmask 205824   ;;  %v3117_v0 = vmov 0.0   ;;  %s4188_s25 = smov (!%p311_p5, %s3103_s25), 1  ;;  %s4190_s9 = smov (!%p313_p6, %s2870_s9), 31  ;;  %vm393_vm2 = vcmask 171048  }
   0xf   : > { %340 = vst.msk [vmem:[#allocation2 + $0x18] sm:$0x3] %vm339_vm1, %v3117_v0  ;;  %s2746_s10 = sshll.u32 %s4188_s25, 6  ;;  %s2745_s11 = sshll.u32 %s4190_s9, 1 }
  0x10   : > { %341 = vst.msk [vmem:[#allocation2 + $0x20] sm:$0xff] %vm335_vm0, %v3117_v0  ;;  %s317_s12 = sadd.s32 %s2746_s10, %s2745_s11  ;;  %s3120_s21 = smov (!%p2752_p7), 127  }
  0x11   : > { %342 = vst.msk [vmem:[#allocation2 + $0x28] sm:$0xff] %vm335_vm0, %v3117_v0  ;;  %s2747_s13 = sshll.u32 %s317_s12, 3  ;;  %s3121_s22 = smov (!%p2752_p7), 126  }
  0x12   : > { %344 = vst.msk [vmem:[#allocation2 + $0x38] sm:$0x3] %vm339_vm1, %v3117_v0  ;;  %s319_s16 = scalar_lea.vmem %s4175_s6, %s2747_s13  ;;  %s3220_s19 = scalar_lea.vmem %s4176_s7, %s2747_s13 }
  0x13   : > { %348 = vst.msk [vmem:[#allocation2 + $0x58] sm:$0x3] %vm339_vm1, %v3117_v0  ;;  %v355_v1 = vld [vmem:[%s319_s16 + $0x10] sm:$0xff]  ;;  %v353_v2 = vld [vmem:[%s319_s16] sm:$0xff]  ;;  %v356_v4 = vld [vmem:[%s319_s16 + $0x18] sm:$0xff] }
  0x14   : > { %352 = vst.msk [vmem:[#allocation2 + $0x78] sm:$0x3] %vm339_vm1, %v3117_v0  ;;  %373 = vrot.lane.b32.xlu1 %v355_v1, %s3118_s20  ;;  %369 = vrot.lane.b32.xlu0 %v353_v2, %s3118_s20  ;;  %v357_v3 = vld [vmem:[%s319_s16 + $0x20] sm:$0xff]  ;;  %v354_v5 = vld [vmem:[%s319_s16 + $0x8] sm:$0xff] }
  0x15   : > { %336 = vst.msk [vmem:[#allocation2] sm:$0xff] %vm335_vm0, %v3117_v0  ;;  %377 = vrot.lane.b32.xlu2 %v357_v3, %s3118_s20  ;;  %v358_v6 = vld [vmem:[%s319_s16 + $0x28] sm:$0xff]  ;;  %v360_v7 = vld [vmem:[%s319_s16 + $0x38] sm:$0xff]  ;;  %v359_v8 = vld [vmem:[%s319_s16 + $0x30] sm:$0xff] }
  0x16   : > { %337 = vst.msk [vmem:[#allocation2 + $0x8] sm:$0xff] %vm335_vm0, %v3117_v0 }
  0x17   : > { %338 = vst.msk [vmem:[#allocation2 + $0x10] sm:$0xff] %vm335_vm0, %v3117_v0 }
  0x18   : > { %343 = vst.msk [vmem:[#allocation2 + $0x30] sm:$0xff] %vm335_vm0, %v3117_v0 }
  0x19   : > { %345 = vst.msk [vmem:[#allocation2 + $0x40] sm:$0xff] %vm335_vm0, %v3117_v0 }
  0x1a   : > { %346 = vst.msk [vmem:[#allocation2 + $0x48] sm:$0xff] %vm335_vm0, %v3117_v0 }
  0x1b   : > { %347 = vst.msk [vmem:[#allocation2 + $0x50] sm:$0xff] %vm335_vm0, %v3117_v0 }
  0x1c   : > { %349 = vst.msk [vmem:[#allocation2 + $0x60] sm:$0xff] %vm335_vm0, %v3117_v0  ;;  %375 = vrot.lane.b32.xlu1 %v356_v4, %s3118_s20  ;;  %371 = vrot.lane.b32.xlu0 %v354_v5, %s3118_s20 }
  0x1d   : > { %350 = vst.msk [vmem:[#allocation2 + $0x68] sm:$0xff] %vm335_vm0, %v3117_v0  ;;  %379 = vrot.lane.b32.xlu2 %v358_v6, %s3118_s20 }
  0x1e   : > { %351 = vst.msk [vmem:[#allocation2 + $0x70] sm:$0xff] %vm335_vm0, %v3117_v0 }
  0x24   : > { %383 = vrot.lane.b32.xlu1 %v360_v7, %s3118_s20  ;;  %381 = vrot.lane.b32.xlu0 %v359_v8, %s3118_s20 }
  0x6f   : > { %v378_v9 = vpop.permute.xlu2 %377 }
  0x70   : > { %398 = vst.msk [vmem:[#allocation2 + $0x45] sm:$0xff] %vm393_vm2, %v378_v9 }
  0x77   : > { %v380_v10 = vpop.permute.xlu2 %379 }
  0x78   : > { %399 = vst.msk [vmem:[#allocation2 + $0x4d] sm:$0xff] %vm393_vm2, %v380_v10 }
  0x86   : > { %v374_v11 = vpop.permute.xlu1 %373  ;;  %v370_v12 = vpop.permute.xlu0 %369 }
  0x87   : > { %396 = vst.msk [vmem:[#allocation2 + $0x25] sm:$0xff] %vm393_vm2, %v374_v11 }
  0x88   : > { %394 = vst.msk [vmem:[#allocation2 + $0x5] sm:$0xff] %vm393_vm2, %v370_v12 }
  0x8e   : > { %v376_v13 = vpop.permute.xlu1 %375  ;;  %v372_v14 = vpop.permute.xlu0 %371 }
  0x8f   : > { %397 = vst.msk [vmem:[#allocation2 + $0x2d] sm:$0xff] %vm393_vm2, %v376_v13 }
  0x90   : > { %395 = vst.msk [vmem:[#allocation2 + $0xd] sm:$0xff] %vm393_vm2, %v372_v14 }
  0x94   : > { %405 = sbr.rel (%p2752_p7) target bundleno = 792 (0x318), region = 52 }
  0x96   : > { %v384_v15 = vpop.permute.xlu1 %383  ;;  %v382_v16 = vpop.permute.xlu0 %381 }
  0x97   : > { %401 = vst.msk [vmem:[#allocation2 + $0x6d] sm:$0xff] %vm393_vm2, %v384_v15 }
  0x98   : > { %400 = vst.msk [vmem:[#allocation2 + $0x65] sm:$0xff] %vm393_vm2, %v382_v16 }
  0x99   : > { %v2935_v17 = vld [vmem:[%s4169_s0 + $0x4] ss:$0 sm:$0xff]  ;;  %v3119_v18 = vmov 0   ;;  %v2936_v19 = vld [vmem:[%s4169_s0 + $0x2] ss:$0 sm:$0xff]  ;;  %v407_v43 = vld [vmem:[#allocation2 + $0xc] sm:$0xff] }
  0x9a   : > { %2934 = vset.pattern.permute.xlu2 %v3119_v18  ;;  %2933 = vset.pattern.permute.xlu1 %v3119_v18  ;;  %v2937_v20 = vld [vmem:[%s4169_s0] ss:$0 sm:$0xff]  ;;  %v2938_v21 = vld [vmem:[%s4169_s0 + $0x5] ss:$0 sm:$0xff]  ;;  %v2939_v22 = vld [vmem:[%s4169_s0 + $0x3] ss:$0 sm:$0xff] }
  0x9b   : > { %2932 = vset.pattern.permute.xlu0 %v3119_v18  ;;  %472 = vperm.xlu2 %2934, %v2935_v17   ;;  %v2940_v23 = vld [vmem:[%s4169_s0 + $0x1] ss:$0 sm:$0xff]  ;;  %v2941_v24 = vld [vmem:[%s4169_s0 + $0x9] ss:$0 sm:$0xff]  ;;  %v2942_v25 = vld [vmem:[%s4169_s0 + $0x7] ss:$0 sm:$0xff] }
  0x9c   : > { %435 = vperm.xlu1 %2933, %v2936_v19   ;;  %427 = vperm.xlu0 %2932, %v2937_v20   ;;  %v2943_v26 = vld [vmem:[%s4169_s0 + $0x6] ss:$0 sm:$0xff]  ;;  %v2944_v27 = vld [vmem:[%s4169_s0 + $0xd] ss:$0 sm:$0xff]  ;;  %v2945_v28 = vld [vmem:[%s4169_s0 + $0x8] ss:$0 sm:$0xff] }
  0x9d   : > { %v2946_v29 = vld [vmem:[%s4169_s0 + $0xa] ss:$0 sm:$0xff]  ;;  %v2947_v30 = vld [vmem:[%s4169_s0 + $0x10] ss:$0 sm:$0xff]  ;;  %v2948_v31 = vld [vmem:[%s4169_s0 + $0xb] ss:$0 sm:$0xff] }
  0x9e   : > { %v2949_v32 = vld [vmem:[%s4169_s0 + $0xe] ss:$0 sm:$0xff]  ;;  %v2950_v33 = vld [vmem:[%s4169_s0 + $0x13] ss:$0 sm:$0xff]  ;;  %v2951_v34 = vld [vmem:[%s4169_s0 + $0xc] ss:$0 sm:$0xff] }
  0x9f   : > { %v2952_v35 = vld [vmem:[%s4169_s0 + $0x11] ss:$0 sm:$0xff]  ;;  %v2953_v36 = vld [vmem:[%s4169_s0 + $0x14] ss:$0 sm:$0xff]  ;;  %v2954_v37 = vld [vmem:[%s4169_s0 + $0xf] ss:$0 sm:$0xff] }
  0xa0   : > { %v2955_v38 = vld [vmem:[%s4169_s0 + $0x15] ss:$0 sm:$0xff]  ;;  %v2956_v39 = vld [vmem:[%s4169_s0 + $0x17] ss:$0 sm:$0xff]  ;;  %v2957_v40 = vld [vmem:[%s4169_s0 + $0x12] ss:$0 sm:$0xff] }
  0xa1   : > { %v2958_v41 = vld [vmem:[%s4169_s0 + $0x16] ss:$0 sm:$0xff]  ;;  %v406_v42 = vld [vmem:[#allocation2 + $0x4] sm:$0xff]  ;;  %v409_v48 = vld [vmem:[#allocation2 + $0x2c] sm:$0xff]  ;;  %vm1094_vm3 = vcmask 130048  }
  0xa2   : > { %v408_v47 = vld [vmem:[#allocation2 + $0x24] sm:$0xff]  ;;  %v3316_v54 = vld [vmem:[#allocation2 + $0x2d] sm:$0xff] }
  0xa3   : > { %476 = vperm.xlu2 %2934, %v2938_v21   ;;  %v3314_v53 = vld [vmem:[#allocation2 + $0x25] sm:$0xff] }
  0xa4   : > { %439 = vperm.xlu1 %2933, %v2939_v22   ;;  %431 = vperm.xlu0 %2932, %v2940_v23   ;;  %v410_v55 = vld [vmem:[#allocation2 + $0x44] sm:$0xff]  ;;  %v411_v56 = vld [vmem:[#allocation2 + $0x4c] sm:$0xff] }
  0xa5   : > { %v412_v2 = vld [vmem:[#allocation2 + $0x64] sm:$0xff]  ;;  %v413_v3 = vld [vmem:[#allocation2 + $0x6c] sm:$0xff] }
  0xa6   : > { %v616_v21 = vld [vmem:[#allocation2 + $0x45] sm:$0xff]  ;;  %v617_v22 = vld [vmem:[#allocation2 + $0x4d] sm:$0xff] }
  0xab   : > { %553 = vperm.xlu2 %2934, %v2941_v24  }
  0xac   : > { %484 = vperm.xlu1 %2933, %v2942_v25   ;;  %480 = vperm.xlu0 %2932, %v2943_v26  }
  0xb3   : > { %638 = vperm.xlu2 %2934, %v2944_v27  }
  0xb4   : > { %549 = vperm.xlu1 %2933, %v2945_v28   ;;  %557 = vperm.xlu0 %2932, %v2946_v29  }
  0xbb   : > { %679 = vperm.xlu2 %2934, %v2947_v30   ;;  %v613_v30 = vld [vmem:[#allocation2 + $0xd] sm:$0xff] }
  0xbc   : > { %561 = vperm.xlu1 %2933, %v2948_v31   ;;  %642 = vperm.xlu0 %2932, %v2949_v32   ;;  %v612_v31 = vld [vmem:[#allocation2 + $0x5] sm:$0xff] }
  0xc3   : > { %691 = vperm.xlu2 %2934, %v2950_v33  }
  0xc4   : > { %634 = vperm.xlu1 %2933, %v2951_v34   ;;  %683 = vperm.xlu0 %2932, %v2952_v35  }
  0xcb   : > { %756 = vperm.xlu2 %2934, %v2953_v36  }
  0xcc   : > { %646 = vperm.xlu1 %2933, %v2954_v37   ;;  %760 = vperm.xlu0 %2932, %v2955_v38  }
  0xd3   : > { %768 = vperm.xlu2 %2934, %v2956_v39  }
  0xd4   : > { %687 = vperm.xlu1 %2933, %v2957_v40   ;;  %v618_v40 = vld [vmem:[#allocation2 + $0x65] sm:$0xff] }
  0xdc   : > { %764 = vperm.xlu1 %2933, %v2958_v41   ;;  %v619_v41 = vld [vmem:[#allocation2 + $0x6d] sm:$0xff] }
  0xf5   : > { %v473_v44 = vpop.permute.xlu2 %472 }
  0xf6   : > { %v487_v45 = vmul.f32 %v473_v44, %v406_v42  ;;  %v488_v46 = vmul.f32 %v473_v44, %v407_v43 }
  0xf8   : > { %505 = vrot.lane.b32.xlu0 %v488_v46, %s3120_s21  ;;  %503 = vrot.lane.b32.xlu2 %v487_v45, %s3120_s21 }
  0xfd   : > { %v477_v49 = vpop.permute.xlu2 %476 }
  0xfe   : > { %v489_v50 = vmul.f32 %v477_v49, %v408_v47  ;;  %v490_v51 = vmul.f32 %v477_v49, %v409_v48 }
 0x100   : > { %507 = vrot.lane.b32.xlu1 %v489_v50, %s3120_s21  ;;  %509 = vrot.lane.b32.xlu2 %v490_v51, %s3120_s21 }
 0x105   : > { %v554_v52 = vpop.permute.xlu2 %553 }
 0x106   : > { %v566_v18 = vmul.f32 %v554_v52, %v408_v47  ;;  %v567_v24 = vmul.f32 %v554_v52, %v409_v48 }
 0x10d   : > { %v639_v57 = vpop.permute.xlu2 %638 }
 0x10e   : > { %v3319_v58 = vmul.f32 %v639_v57, %v3314_v53  ;;  %v3322_v59 = vmul.f32 %v639_v57, %v3316_v54  ;;  %v436_v60 = vpop.permute.xlu1 %435  ;;  %v428_v63 = vpop.permute.xlu0 %427 }
 0x10f   : > { %v3324_v61 = vmul.f32 %v436_v60, %v410_v55  ;;  %v3326_v62 = vmul.f32 %v436_v60, %v411_v56  ;;  %v3328_v0 = vmul.f32 %v428_v63, %v406_v42  ;;  %v3330_v1 = vmul.f32 %v428_v63, %v407_v43 }
 0x115   : > { %v680_v20 = vpop.permute.xlu2 %679 }
 0x116   : > { %v440_v4 = vpop.permute.xlu1 %439  ;;  %v432_v7 = vpop.permute.xlu0 %431  ;;  %v695_v37 = vmul.f32 %v680_v20, %v613_v30  ;;  %v694_v51 = vmul.f32 %v680_v20, %v612_v31 }
 0x117   : > { %v3332_v5 = vmul.f32 %v440_v4, %v412_v2  ;;  %v3334_v6 = vmul.f32 %v440_v4, %v413_v3  ;;  %v3336_v8 = vmul.f32 %v432_v7, %v408_v47  ;;  %v3338_v9 = vmul.f32 %v432_v7, %v409_v48 }
 0x11d   : > { %v692_v32 = vpop.permute.xlu2 %691 }
 0x11e   : > { %v485_v10 = vpop.permute.xlu1 %484  ;;  %v481_v12 = vpop.permute.xlu0 %480 }
 0x11f   : > { %v493_v11 = vmul.f32 %v485_v10, %v412_v2  ;;  %v491_v13 = vmul.f32 %v481_v12, %v410_v55  ;;  %v492_v14 = vmul.f32 %v481_v12, %v411_v56  ;;  %v494_v19 = vmul.f32 %v485_v10, %v413_v3  ;;  %v2959_v12 = vld [vmem:[%s4169_s0 + $0x18] ss:$0 sm:$0xff] }
 0x120   : > { %v700_v10 = vmul.f32 %v692_v32, %v618_v40 }
 0x121   : > { %515 = vrot.lane.b32.xlu2 %v493_v11, %s3120_s21  ;;  %513 = vrot.lane.b32.xlu1 %v492_v14, %s3120_s21 }
 0x122   : > { %511 = vrot.lane.b32.xlu0 %v491_v13, %s3120_s21 }
 0x125   : > { %v757_v46 = vpop.permute.xlu2 %756 }
 0x126   : > { %v550_v15 = vpop.permute.xlu1 %549  ;;  %v558_v17 = vpop.permute.xlu0 %557  ;;  %v772_v4 = vmul.f32 %v757_v46, %v613_v30  ;;  %v771_v14 = vmul.f32 %v757_v46, %v612_v31 }
 0x127   : > { %v564_v16 = vmul.f32 %v550_v15, %v406_v42  ;;  %v565_v26 = vmul.f32 %v550_v15, %v407_v43  ;;  %v569_v27 = vmul.f32 %v558_v17, %v411_v56  ;;  %v568_v38 = vmul.f32 %v558_v17, %v410_v55 }
 0x128   : > { %v701_v56 = vmul.f32 %v692_v32, %v619_v41 }
 0x129   : > { %580 = vrot.lane.b32.xlu2 %v564_v16, %s3121_s22  ;;  %584 = vrot.lane.b32.xlu1 %v566_v18, %s3121_s22  ;;  %v2961_v18 = vld [vmem:[%s4169_s0 + $0x1a] ss:$0 sm:$0xff] }
 0x12a   : > { %517 = vrot.lane.b32.xlu0 %v494_v19, %s3120_s21  ;;  %v2962_v19 = vld [vmem:[%s4169_s0 + $0x1e] ss:$0 sm:$0xff] }
 0x12d   : > { %v769_v52 = vpop.permute.xlu2 %768 }
 0x12e   : > { %v562_v23 = vpop.permute.xlu1 %561  ;;  %v643_v25 = vpop.permute.xlu0 %642  ;;  %v778_v15 = vmul.f32 %v769_v52, %v619_v41  ;;  %v777_v20 = vmul.f32 %v769_v52, %v618_v40 }
 0x12f   : > { %v3346_v28 = vmul.f32 %v643_v25, %v616_v21  ;;  %v3348_v29 = vmul.f32 %v643_v25, %v617_v22  ;;  %v570_v34 = vmul.f32 %v562_v23, %v412_v2  ;;  %v571_v47 = vmul.f32 %v562_v23, %v413_v3  ;;  %v2964_v23 = vld [vmem:[%s4169_s0 + $0x19] ss:$0 sm:$0xff] }
 0x131   : > { %586 = vrot.lane.b32.xlu2 %v567_v24, %s3121_s22  ;;  %590 = vrot.lane.b32.xlu1 %v569_v27, %s3121_s22 }
 0x132   : > { %582 = vrot.lane.b32.xlu0 %v565_v26, %s3121_s22  ;;  %v2967_v26 = vld [vmem:[%s4169_s0 + $0x1c] ss:$0 sm:$0xff] }
 0x136   : > { %v635_v33 = vpop.permute.xlu1 %634  ;;  %v684_v39 = vpop.permute.xlu0 %683 }
 0x137   : > { %v3353_v35 = vmul.f32 %v635_v33, %v612_v31  ;;  %v3355_v36 = vmul.f32 %v635_v33, %v613_v30  ;;  %v696_v43 = vmul.f32 %v684_v39, %v3314_v53  ;;  %v697_v60 = vmul.f32 %v684_v39, %v3316_v54  ;;  %v2968_v31 = vld [vmem:[%s4169_s0 + $0x23] ss:$0 sm:$0xff] }
 0x139   : > { %592 = vrot.lane.b32.xlu2 %v570_v34, %s3121_s22  ;;  %712 = vrot.lane.b32.xlu1 %v695_v37, %s3120_s21  ;;  %v2970_v37 = vld [vmem:[%s4169_s0 + $0x22] ss:$0 sm:$0xff] }
 0x13a   : > { %588 = vrot.lane.b32.xlu0 %v568_v38, %s3121_s22 }
 0x13e   : > { %v647_v42 = vpop.permute.xlu1 %646  ;;  %v761_v55 = vpop.permute.xlu0 %760 }
 0x13f   : > { %v3361_v44 = vmul.f32 %v647_v42, %v618_v40  ;;  %v3363_v45 = vmul.f32 %v647_v42, %v619_v41  ;;  %v773_v57 = vmul.f32 %v761_v55, %v3314_v53  ;;  %v774_v16 = vmul.f32 %v761_v55, %v3316_v54 }
 0x141   : > { %714 = vrot.lane.b32.xlu2 %v696_v43, %s3120_s21 }
 0x142   : > { %594 = vrot.lane.b32.xlu0 %v571_v47, %s3121_s22 }
 0x146   : > { %v688_v48 = vpop.permute.xlu1 %687 }
 0x147   : > { %v698_v49 = vmul.f32 %v688_v48, %v616_v21  ;;  %v699_v50 = vmul.f32 %v688_v48, %v617_v22 }
 0x149   : > { %718 = vrot.lane.b32.xlu1 %v698_v49, %s3120_s21  ;;  %720 = vrot.lane.b32.xlu2 %v699_v50, %s3120_s21 }
 0x14a   : > { %710 = vrot.lane.b32.xlu0 %v694_v51, %s3120_s21 }
 0x14e   : > { %v765_v3 = vpop.permute.xlu1 %764 }
 0x14f   : > { %v776_v7 = vmul.f32 %v765_v3, %v617_v22  ;;  %v775_v13 = vmul.f32 %v765_v3, %v616_v21  ;;  %v2965_v22 = vld [vmem:[%s4169_s0 + $0x21] ss:$0 sm:$0xff] }
 0x151   : > { %724 = vrot.lane.b32.xlu1 %v701_v56, %s3120_s21  ;;  %791 = vrot.lane.b32.xlu2 %v773_v57, %s3121_s22 }
 0x152   : > { %716 = vrot.lane.b32.xlu0 %v697_v60, %s3120_s21  ;;  %v504_v63 = vpop.permute.xlu2 %503 }
 0x153   : > { %v527_v2 = vadd.f32 %v504_v63, %v3328_v0  ;;  %v2960_v0 = vld [vmem:[%s4169_s0 + $0x1b] ss:$0 sm:$0xff] }
 0x159   : > { %789 = vrot.lane.b32.xlu1 %v772_v4, %s3121_s22  ;;  %797 = vrot.lane.b32.xlu2 %v776_v7, %s3121_s22 }
 0x15a   : > { %722 = vrot.lane.b32.xlu0 %v700_v10, %s3120_s21  ;;  %v510_v53 = vpop.permute.xlu2 %509 }
 0x15b   : > { %v530_v11 = vadd.f32 %v510_v53, %v3338_v9 }
 0x161   : > { %795 = vrot.lane.b32.xlu1 %v775_v13, %s3121_s22  ;;  %841 = vperm.xlu2 %2934, %v2959_v12  }
 0x162   : > { %787 = vrot.lane.b32.xlu0 %v771_v14, %s3121_s22 }
 0x169   : > { %801 = vrot.lane.b32.xlu1 %v778_v15, %s3121_s22  ;;  %853 = vperm.xlu2 %2934, %v2960_v0   ;;  %v819_v0 = vld [vmem:[#allocation2 + $0x6] sm:$0xff]  ;;  %v3436_v15 = vld [vmem:[#allocation2 + $0xe] sm:$0xff] }
 0x16a   : > { %793 = vrot.lane.b32.xlu0 %v774_v16, %s3121_s22  ;;  %v506_v9 = vpop.permute.xlu0 %505 }
 0x16b   : > { %v528_v17 = vadd.f32 %v506_v9, %v3330_v1  ;;  %v2963_v1 = vld [vmem:[%s4169_s0 + $0x1d] ss:$0 sm:$0xff] }
 0x171   : > { %849 = vperm.xlu1 %2933, %v2961_v18   ;;  %894 = vperm.xlu2 %2934, %v2962_v19  }
 0x172   : > { %799 = vrot.lane.b32.xlu0 %v777_v20, %s3121_s22  ;;  %v508_v54 = vpop.permute.xlu1 %507  ;;  %v3439_v20 = vld [vmem:[#allocation2 + $0x66] sm:$0xff] }
 0x173   : > { %v529_v21 = vadd.f32 %v508_v54, %v3336_v8  ;;  %v2966_v8 = vld [vmem:[%s4169_s0 + $0x20] ss:$0 sm:$0xff] }
 0x179   : > { %890 = vperm.xlu1 %2933, %v2963_v1   ;;  %967 = vperm.xlu2 %2934, %v2965_v22  }
 0x17a   : > { %845 = vperm.xlu0 %2932, %v2964_v23  }
 0x17b   : > { %v516_v24 = vpop.permute.xlu2 %515 }
 0x17c   : > { %v533_v25 = vadd.f32 %v516_v24, %v3332_v5  ;;  %v2969_v5 = vld [vmem:[%s4169_s0 + $0x1f] ss:$0 sm:$0xff] }
 0x181   : > { %963 = vperm.xlu1 %2933, %v2966_v8  }
 0x182   : > { %886 = vperm.xlu0 %2932, %v2967_v26  }
 0x183   : > { %v581_v27 = vpop.permute.xlu2 %580 }
 0x184   : > { %v604_v30 = vadd.f32 %v581_v27, %v527_v2 }
 0x186   : > { %v657_v32 = vadd.f32 %v3353_v35, %v604_v30 }
 0x189   : > { %975 = vperm.xlu1 %2933, %v2968_v31  }
 0x18a   : > { %898 = vperm.xlu0 %2932, %v2969_v5  }
 0x18b   : > { %v587_v33 = vpop.permute.xlu2 %586 }
 0x18c   : > { %v607_v34 = vadd.f32 %v587_v33, %v530_v11 }
 0x18e   : > { %v660_v38 = vadd.f32 %v3322_v59, %v607_v34 }
 0x192   : > { %971 = vperm.xlu0 %2932, %v2970_v37  }
 0x193   : > { %v593_v39 = vpop.permute.xlu2 %592  ;;  %v514_v40 = vpop.permute.xlu1 %513 }
 0x194   : > { %v512_v41 = vpop.permute.xlu0 %511  ;;  %v610_v42 = vadd.f32 %v593_v39, %v533_v25  ;;  %v532_v43 = vadd.f32 %v514_v40, %v3326_v62 }
 0x195   : > { %v531_v46 = vadd.f32 %v512_v41, %v3324_v61 }
 0x196   : > { %v663_v35 = vadd.f32 %v3361_v44, %v610_v42 }
 0x19b   : > { %v715_v47 = vpop.permute.xlu2 %714  ;;  %v585_v48 = vpop.permute.xlu1 %584 }
 0x19c   : > { %v518_v49 = vpop.permute.xlu0 %517  ;;  %v606_v50 = vadd.f32 %v585_v48, %v529_v21 }
 0x19d   : > { %v534_v51 = vadd.f32 %v518_v49, %v3334_v6 }
 0x19e   : > { %v659_v52 = vadd.f32 %v3319_v58, %v606_v50 }
 0x1a0   : > { %v736_v59 = vadd.f32 %v715_v47, %v659_v52 }
 0x1a3   : > { %v721_v55 = vpop.permute.xlu2 %720  ;;  %v591_v56 = vpop.permute.xlu1 %590 }
 0x1a4   : > { %v583_v57 = vpop.permute.xlu0 %582  ;;  %v609_v60 = vadd.f32 %v591_v56, %v532_v43  ;;  %v823_v43 = vld [vmem:[#allocation2 + $0x46] sm:$0xff]  ;;  %v822_v56 = vld [vmem:[#allocation2 + $0x2e] sm:$0xff] }
 0x1a5   : > { %v605_v63 = vadd.f32 %v583_v57, %v528_v17 }
 0x1a6   : > { %v662_v62 = vadd.f32 %v3348_v29, %v609_v60 }
 0x1a7   : > { %v658_v61 = vadd.f32 %v3355_v36, %v605_v63 }
 0x1a8   : > { %v739_v2 = vadd.f32 %v721_v55, %v662_v62 }
 0x1ab   : > { %v792_v44 = vpop.permute.xlu2 %791  ;;  %v713_v3 = vpop.permute.xlu1 %712 }
 0x1ac   : > { %v589_v4 = vpop.permute.xlu0 %588  ;;  %v813_v7 = vadd.f32 %v792_v44, %v736_v59  ;;  %v735_v10 = vadd.f32 %v713_v3, %v658_v61  ;;  %v821_v59 = vld [vmem:[#allocation2 + $0x26] sm:$0xff] }
 0x1ad   : > { %v608_v53 = vadd.f32 %v589_v4, %v531_v46 }
 0x1af   : > { %v661_v6 = vadd.f32 %v3346_v28, %v608_v53  ;;  %v3441_v28 = vld [vmem:[#allocation2 + $0x6e] sm:$0xff] }
 0x1b3   : > { %v798_v58 = vpop.permute.xlu2 %797 }
 0x1b4   : > { %v595_v11 = vpop.permute.xlu0 %594  ;;  %v816_v12 = vadd.f32 %v798_v58, %v739_v2 }
 0x1b5   : > { %v611_v13 = vadd.f32 %v595_v11, %v534_v51 }
 0x1b7   : > { %v664_v14 = vadd.f32 %v3363_v45, %v611_v13 }
 0x1bb   : > { %v719_v29 = vpop.permute.xlu1 %718  ;;  %v842_v36 = vpop.permute.xlu2 %841 }
 0x1bc   : > { %v738_v16 = vadd.f32 %v719_v29, %v661_v6  ;;  %v711_v9 = vpop.permute.xlu0 %710  ;;  %v856_v17 = vmul.f32 %v842_v36, %v819_v0  ;;  %v857_v18 = vmul.f32 %v842_v36, %v3436_v15 }
 0x1bd   : > { %v734_v19 = vadd.f32 %v711_v9, %v657_v32 }
 0x1c3   : > { %v725_v54 = vpop.permute.xlu1 %724  ;;  %v854_v21 = vpop.permute.xlu2 %853 }
 0x1c4   : > { %v741_v1 = vadd.f32 %v725_v54, %v664_v14  ;;  %v717_v22 = vpop.permute.xlu0 %716  ;;  %v862_v45 = vmul.f32 %v854_v21, %v3439_v20  ;;  %v863_v23 = vmul.f32 %v854_v21, %v3441_v28 }
 0x1c5   : > { %v737_v24 = vadd.f32 %v717_v22, %v660_v38  ;;  %v824_v38 = vld [vmem:[#allocation2 + $0x4e] sm:$0xff]  ;;  %v2974_v22 = vld [vmem:[%s4170_s1 + $0x3] ss:$0 sm:$0xff] }
 0x1cb   : > { %v790_v25 = vpop.permute.xlu1 %789  ;;  %v895_v44 = vpop.permute.xlu2 %894 }
 0x1cc   : > { %v812_v8 = vadd.f32 %v790_v25, %v735_v10  ;;  %v723_v26 = vpop.permute.xlu0 %722  ;;  %v906_v3 = vmul.f32 %v895_v44, %v824_v38  ;;  %v905_v11 = vmul.f32 %v895_v44, %v823_v43 }
 0x1cd   : > { %v740_v27 = vadd.f32 %v723_v26, %v663_v35 }
 0x1ce   : > { %v3445_v30 = vadd.f32 %v857_v18, %v812_v8 }
 0x1d3   : > { %v796_v31 = vpop.permute.xlu1 %795 }
 0x1d4   : > { %v815_v5 = vadd.f32 %v796_v31, %v738_v16  ;;  %v788_v32 = vpop.permute.xlu0 %787 }
 0x1d5   : > { %v811_v33 = vadd.f32 %v788_v32, %v734_v19  ;;  %v2971_v19 = vld [vmem:[%s4170_s1 + $0x1] ss:$0 sm:$0xff] }
 0x1d7   : > { %v3447_v34 = vadd.f32 %v856_v17, %v811_v33 }
 0x1db   : > { %v802_v37 = vpop.permute.xlu1 %801 }
 0x1dc   : > { %v818_v39 = vadd.f32 %v802_v37, %v741_v1  ;;  %v794_v40 = vpop.permute.xlu0 %793  ;;  %v2973_v1 = vld [vmem:[%s4170_s1 + $0x2] ss:$0 sm:$0xff] }
 0x1dd   : > { %v814_v41 = vadd.f32 %v794_v40, %v737_v24 }
 0x1de   : > { %v3449_v42 = vadd.f32 %v863_v23, %v818_v39 }
 0x1e3   : > { %v850_v46 = vpop.permute.xlu1 %849 }
 0x1e4   : > { %v860_v47 = vmul.f32 %v850_v46, %v823_v43  ;;  %v861_v48 = vmul.f32 %v850_v46, %v824_v38  ;;  %v800_v35 = vpop.permute.xlu0 %799 }
 0x1e5   : > { %v817_v49 = vadd.f32 %v800_v35, %v740_v27 }
 0x1e6   : > { %v3451_v50 = vadd.f32 %v861_v48, %v816_v12  ;;  %v3453_v51 = vadd.f32 %v860_v47, %v815_v5 }
 0x1e7   : > { %v3455_v52 = vadd.f32 %v862_v45, %v817_v49 }
 0x1eb   : > { %v891_v55 = vpop.permute.xlu1 %890 }
 0x1ec   : > { %v903_v57 = vmul.f32 %v891_v55, %v821_v59  ;;  %v846_v60 = vpop.permute.xlu0 %845  ;;  %v904_v12 = vmul.f32 %v891_v55, %v822_v56 }
 0x1ed   : > { %v858_v63 = vmul.f32 %v846_v60, %v821_v59  ;;  %v859_v62 = vmul.f32 %v846_v60, %v822_v56 }
 0x1ee   : > { %921 = vrot.lane.b32.xlu1 %v903_v57, %s3120_s21 }
 0x1ef   : > { %v3458_v61 = vadd.f32 %v859_v62, %v814_v41  ;;  %v866_v2 = vadd.f32 %v858_v63, %v813_v7  ;;  %v968_v7 = vpop.permute.xlu2 %967 }
 0x1f0   : > { %v981_v14 = vmul.f32 %v968_v7, %v822_v56  ;;  %v980_v9 = vmul.f32 %v968_v7, %v821_v59 }
 0x1f3   : > { %v964_v6 = vpop.permute.xlu1 %963 }
 0x1f4   : > { %v887_v4 = vpop.permute.xlu0 %886  ;;  %v978_v58 = vmul.f32 %v964_v6, %v819_v0  ;;  %v979_v17 = vmul.f32 %v964_v6, %v3436_v15 }
 0x1f5   : > { %v901_v10 = vmul.f32 %v887_v4, %v819_v0  ;;  %v902_v53 = vmul.f32 %v887_v4, %v3436_v15  ;;  %v2972_v15 = vld [vmem:[%s4170_s1] ss:$0 sm:$0xff] }
 0x1f6   : > { %927 = vrot.lane.b32.xlu1 %v906_v3, %s3120_s21 }
 0x1f7   : > { %919 = vrot.lane.b32.xlu0 %v902_v53, %s3120_s21  ;;  %917 = vrot.lane.b32.xlu2 %v901_v10, %s3120_s21 }
 0x1fb   : > { %v976_v0 = vpop.permute.xlu1 %975 }
 0x1fc   : > { %v899_v13 = vpop.permute.xlu0 %898  ;;  %v984_v16 = vmul.f32 %v976_v0, %v3439_v20 }
 0x1fd   : > { %v907_v29 = vmul.f32 %v899_v13, %v3439_v20  ;;  %v908_v36 = vmul.f32 %v899_v13, %v3441_v28  ;;  %v985_v20 = vmul.f32 %v976_v0, %v3441_v28 }
 0x1fe   : > { %994 = vrot.lane.b32.xlu1 %v978_v58, %s3121_s22 }
 0x1ff   : > { %923 = vrot.lane.b32.xlu2 %v904_v12, %s3120_s21  ;;  %925 = vrot.lane.b32.xlu0 %v905_v11, %s3120_s21 }
 0x204   : > { %v972_v18 = vpop.permute.xlu0 %971 }
 0x205   : > { %v982_v54 = vmul.f32 %v972_v18, %v823_v43  ;;  %v983_v21 = vmul.f32 %v972_v18, %v824_v38 }
 0x206   : > { %1000 = vrot.lane.b32.xlu1 %v981_v14, %s3121_s22 }
 0x207   : > { %929 = vrot.lane.b32.xlu2 %v907_v29, %s3120_s21  ;;  %931 = vrot.lane.b32.xlu0 %v908_v36, %s3120_s21 }
 0x20e   : > { %1006 = vrot.lane.b32.xlu1 %v984_v16, %s3121_s22 }
 0x20f   : > { %996 = vrot.lane.b32.xlu2 %v979_v17, %s3121_s22  ;;  %998 = vrot.lane.b32.xlu0 %v980_v9, %s3121_s22 }
 0x216   : > { %1043 = vperm.xlu1 %2933, %v2971_v19  }
 0x217   : > { %1002 = vrot.lane.b32.xlu2 %v982_v54, %s3121_s22  ;;  %1004 = vrot.lane.b32.xlu0 %v983_v21, %s3121_s22 }
 0x21f   : > { %1008 = vrot.lane.b32.xlu2 %v985_v20, %s3121_s22  ;;  %1039 = vperm.xlu0 %2932, %v2972_v15   ;;  %s3122_s22 = smov 124  }
 0x227   : > { %1047 = vperm.xlu2 %2934, %v2973_v1   ;;  %1051 = vperm.xlu0 %2932, %v2974_v22  }
 0x251   : > { %v918_v45 = vpop.permute.xlu2 %917 }
 0x252   : > { %v941_v59 = vadd.f32 %v918_v45, %v3447_v34 }
 0x259   : > { %v924_v23 = vpop.permute.xlu2 %923 }
 0x260   : > { %v922_v24 = vpop.permute.xlu1 %921 }
 0x261   : > { %v930_v25 = vpop.permute.xlu2 %929  ;;  %v943_v40 = vadd.f32 %v922_v24, %v866_v2 }
 0x268   : > { %v928_v8 = vpop.permute.xlu1 %927 }
 0x269   : > { %v920_v26 = vpop.permute.xlu0 %919  ;;  %v997_v31 = vpop.permute.xlu2 %996  ;;  %v946_v48 = vadd.f32 %v928_v8, %v3451_v50 }
 0x26a   : > { %v942_v35 = vadd.f32 %v920_v26, %v3445_v30  ;;  %v944_v30 = vadd.f32 %v924_v23, %v3458_v61 }
 0x26c   : > { %v1019_v55 = vadd.f32 %v997_v31, %v942_v35 }
 0x270   : > { %v995_v28 = vpop.permute.xlu1 %994 }
 0x271   : > { %v926_v27 = vpop.permute.xlu0 %925  ;;  %v1003_v33 = vpop.permute.xlu2 %1002  ;;  %v1018_v56 = vadd.f32 %v995_v28, %v941_v59 }
 0x272   : > { %v945_v44 = vadd.f32 %v926_v27, %v3453_v51  ;;  %v947_v51 = vadd.f32 %v930_v25, %v3455_v52 }
 0x274   : > { %v1022_v50 = vadd.f32 %v1003_v33, %v945_v44 }
 0x278   : > { %v1001_v5 = vpop.permute.xlu1 %1000 }
 0x279   : > { %v932_v32 = vpop.permute.xlu0 %931  ;;  %v1009_v41 = vpop.permute.xlu2 %1008  ;;  %v1021_v3 = vadd.f32 %v1001_v5, %v944_v30 }
 0x27a   : > { %v948_v10 = vadd.f32 %v932_v32, %v3449_v42 }
 0x27c   : > { %v1025_v6 = vadd.f32 %v1009_v41, %v948_v10 }
 0x280   : > { %v1007_v37 = vpop.permute.xlu1 %1006 }
 0x281   : > { %v999_v39 = vpop.permute.xlu0 %998  ;;  %v1048_v57 = vpop.permute.xlu2 %1047  ;;  %v1024_v61 = vadd.f32 %v1007_v37, %v947_v51 }
 0x282   : > { %v1020_v43 = vadd.f32 %v999_v39, %v943_v40  ;;  %v1058_v34 = vadd.f32 %v1048_v57, %v1022_v50 }
 0x288   : > { %v1044_v38 = vpop.permute.xlu1 %1043 }
 0x289   : > { %v1056_v46 = vadd.f32 %v1044_v38, %v1020_v43  ;;  %v1005_v47 = vpop.permute.xlu0 %1004  ;;  %v1057_v4 = vadd.f32 %v1044_v38, %v1021_v3 }
 0x28a   : > { %v1023_v49 = vadd.f32 %v1005_v47, %v946_v48 }
 0x28b   : > { %1074 = vrot.lane.b32.xlu0 %v1056_v46, %s3122_s22 }
 0x28c   : > { %v1059_v60 = vadd.f32 %v1048_v57, %v1023_v49 }
 0x291   : > { %v1040_v63 = vpop.permute.xlu0 %1039 }
 0x292   : > { %v1054_v62 = vadd.f32 %v1040_v63, %v1018_v56  ;;  %v1055_v2 = vadd.f32 %v1040_v63, %v1019_v55 }
 0x293   : > { %1080 = vrot.lane.b32.xlu0 %v1059_v60, %s3122_s22 }
 0x294   : > { %1072 = vrot.lane.b32.xlu2 %v1055_v2, %s3122_s22  ;;  %1070 = vrot.lane.b32.xlu1 %v1054_v62, %s3122_s22 }
 0x299   : > { %v1052_v53 = vpop.permute.xlu0 %1051 }
 0x29a   : > { %v1060_v58 = vadd.f32 %v1052_v53, %v1024_v61  ;;  %v1061_v11 = vadd.f32 %v1052_v53, %v1025_v6 }
 0x29c   : > { %1078 = vrot.lane.b32.xlu2 %v1058_v34, %s3122_s22  ;;  %1076 = vrot.lane.b32.xlu1 %v1057_v4, %s3122_s22 }
 0x2a4   : > { %1084 = vrot.lane.b32.xlu2 %v1061_v11, %s3122_s22  ;;  %1082 = vrot.lane.b32.xlu1 %v1060_v58, %s3122_s22 }
 0x2ee   : > { %v1073_v42 = vpop.permute.xlu2 %1072 }
 0x2ef   : > { %1096 = vst.msk [vmem:[%s3220_s19 + $0x8] sm:$0xff] %vm1094_vm3, %v1073_v42 }
 0x2f6   : > { %v1079_v12 = vpop.permute.xlu2 %1078 }
 0x2f7   : > { %1099 = vst.msk [vmem:[%s3220_s19 + $0x20] sm:$0xff] %vm1094_vm3, %v1079_v12 }
 0x2fd   : > { %v1075_v52 = vpop.permute.xlu0 %1074 }
 0x2fe   : > { %1097 = vst.msk [vmem:[%s3220_s19 + $0x10] sm:$0xff] %vm1094_vm3, %v1075_v52  ;;  %v1085_v7 = vpop.permute.xlu2 %1084 }
 0x2ff   : > { %1102 = vst.msk [vmem:[%s3220_s19 + $0x38] sm:$0xff] %vm1094_vm3, %v1085_v7 }
 0x305   : > { %v1081_v13 = vpop.permute.xlu0 %1080 }
 0x306   : > { %1100 = vst.msk [vmem:[%s3220_s19 + $0x28] sm:$0xff] %vm1094_vm3, %v1081_v13  ;;  %v1071_v14 = vpop.permute.xlu1 %1070 }
 0x307   : > { %1095 = vst.msk [vmem:[%s3220_s19] sm:$0xff] %vm1094_vm3, %v1071_v14 }
 0x30e   : > { %v1077_v29 = vpop.permute.xlu1 %1076 }
 0x30f   : > { %1098 = vst.msk [vmem:[%s3220_s19 + $0x18] sm:$0xff] %vm1094_vm3, %v1077_v29 }
 0x316   : > { %v1083_v36 = vpop.permute.xlu1 %1082 }
 0x317   : > { %1101 = vst.msk [vmem:[%s3220_s19 + $0x30] sm:$0xff] %vm1094_vm3, %v1083_v36 }
 0x318 PF: > { %p2785_p8 = scmp.ne.s32.totalorder %s3099_s24, 1 }
 0x319   : > { %s3124_s17 = smov (!%p2785_p8), 127   ;;  %s3125_s21 = smov (!%p2785_p8), 126  }
 0x31a   : > { %1106 = sbr.rel (%p2785_p8) target bundleno = 1934 (0x78e), region = 56  ;;  %s3126_s18 = smov (!%p2785_p8), 125  }
 0x31b   : > { %s3127_s20 = smov (!%p2785_p8), 124   ;;  %s3128_s13 = smov (!%p2785_p8), 123  }
 0x31c   : > { %s3129_s25 = smov (!%p2785_p8), 122   ;;  %s3130_s15 = smov (!%p2785_p8), 121  }
 0x31d   : > { %s3131_s22 = smov (!%p2785_p8), 120   ;;  %s3133_s10 = smov (!%p2785_p8), 118  }
 0x31f   : > { %v2978_v0 = vld [vmem:[%s4171_s2 + $0x4] ss:$0 sm:$0xff]  ;;  %v3123_v16 = vmov 0   ;;  %v2979_v9 = vld [vmem:[%s4171_s2 + $0x2] ss:$0 sm:$0xff]  ;;  %v3585_v5 = vld [vmem:[#allocation2 + $0x5] sm:$0xff] }
 0x320   : > { %2977 = vset.pattern.permute.xlu2 %v3123_v16  ;;  %2976 = vset.pattern.permute.xlu1 %v3123_v16  ;;  %v2980_v17 = vld [vmem:[%s4171_s2] ss:$0 sm:$0xff]  ;;  %v2981_v18 = vld [vmem:[%s4171_s2 + $0x5] ss:$0 sm:$0xff]  ;;  %v2982_v19 = vld [vmem:[%s4171_s2 + $0x3] ss:$0 sm:$0xff] }
 0x321   : > { %2975 = vset.pattern.permute.xlu0 %v3123_v16  ;;  %1173 = vperm.xlu2 %2977, %v2978_v0   ;;  %v2983_v54 = vld [vmem:[%s4171_s2 + $0x1] ss:$0 sm:$0xff]  ;;  %v2984_v21 = vld [vmem:[%s4171_s2 + $0x9] ss:$0 sm:$0xff]  ;;  %v2985_v15 = vld [vmem:[%s4171_s2 + $0x7] ss:$0 sm:$0xff] }
 0x322   : > { %1136 = vperm.xlu1 %2976, %v2979_v9   ;;  %1128 = vperm.xlu0 %2975, %v2980_v17   ;;  %v2986_v20 = vld [vmem:[%s4171_s2 + $0x6] ss:$0 sm:$0xff]  ;;  %v2987_v1 = vld [vmem:[%s4171_s2 + $0xd] ss:$0 sm:$0xff]  ;;  %v2988_v22 = vld [vmem:[%s4171_s2 + $0x8] ss:$0 sm:$0xff] }
 0x323   : > { %v2989_v45 = vld [vmem:[%s4171_s2 + $0xa] ss:$0 sm:$0xff]  ;;  %v2990_v23 = vld [vmem:[%s4171_s2 + $0x11] ss:$0 sm:$0xff]  ;;  %v2991_v24 = vld [vmem:[%s4171_s2 + $0xb] ss:$0 sm:$0xff] }
 0x324   : > { %v2992_v25 = vld [vmem:[%s4171_s2 + $0xe] ss:$0 sm:$0xff]  ;;  %v2993_v8 = vld [vmem:[%s4171_s2 + $0xc] ss:$0 sm:$0xff]  ;;  %v2994_v26 = vld [vmem:[%s4171_s2 + $0x12] ss:$0 sm:$0xff] }
 0x325   : > { %v2995_v28 = vld [vmem:[%s4171_s2 + $0xf] ss:$0 sm:$0xff]  ;;  %v2996_v27 = vld [vmem:[%s4171_s2 + $0x10] ss:$0 sm:$0xff]  ;;  %v2997_v31 = vld [vmem:[%s4171_s2 + $0x13] ss:$0 sm:$0xff] }
 0x326   : > { %v3587_v32 = vld [vmem:[#allocation2 + $0xd] sm:$0xff]  ;;  %v3593_v40 = vld [vmem:[#allocation2 + $0x25] sm:$0xff]  ;;  %vm1965_vm4 = vcmask 130048  }
 0x327   : > { %v3595_v41 = vld [vmem:[#allocation2 + $0x2d] sm:$0xff]  ;;  %v3609_v59 = vld [vmem:[#allocation2 + $0x65] sm:$0xff] }
 0x328   : > { %v3611_v56 = vld [vmem:[#allocation2 + $0x45] sm:$0xff]  ;;  %v3613_v57 = vld [vmem:[#allocation2 + $0x4d] sm:$0xff] }
 0x329   : > { %1177 = vperm.xlu2 %2977, %v2981_v18   ;;  %v3621_v50 = vld [vmem:[#allocation2 + $0x6d] sm:$0xff] }
 0x32a   : > { %1140 = vperm.xlu1 %2976, %v2982_v19   ;;  %1132 = vperm.xlu0 %2975, %v2983_v54  }
 0x331   : > { %1254 = vperm.xlu2 %2977, %v2984_v21  }
 0x332   : > { %1185 = vperm.xlu1 %2976, %v2985_v15   ;;  %1181 = vperm.xlu0 %2975, %v2986_v20  }
 0x339   : > { %1331 = vperm.xlu2 %2977, %v2987_v1  }
 0x33a   : > { %1250 = vperm.xlu1 %2976, %v2988_v22   ;;  %1258 = vperm.xlu0 %2975, %v2989_v45   ;;  %v2998_v45 = vld [vmem:[%s4171_s2 + $0x14] ss:$0 sm:$0xff] }
 0x341   : > { %1408 = vperm.xlu2 %2977, %v2990_v23  }
 0x342   : > { %1262 = vperm.xlu1 %2976, %v2991_v24   ;;  %1335 = vperm.xlu0 %2975, %v2992_v25  }
 0x34a   : > { %1327 = vperm.xlu1 %2976, %v2993_v8   ;;  %1412 = vperm.xlu0 %2975, %v2994_v26  }
 0x352   : > { %1339 = vperm.xlu1 %2976, %v2995_v28   ;;  %v2999_v28 = vld [vmem:[%s4171_s2 + $0x17] ss:$0 sm:$0xff] }
 0x35a   : > { %1404 = vperm.xlu1 %2976, %v2996_v27  }
 0x362   : > { %1416 = vperm.xlu1 %2976, %v2997_v31  }
 0x37b   : > { %v1174_v33 = vpop.permute.xlu2 %1173 }
 0x37c   : > { %v1188_v37 = vmul.f32 %v1174_v33, %v3585_v5  ;;  %v1189_v39 = vmul.f32 %v1174_v33, %v3587_v32 }
 0x37e   : > { %1206 = vrot.lane.b32.xlu0 %v1189_v39, %s3124_s17  ;;  %1204 = vrot.lane.b32.xlu2 %v1188_v37, %s3124_s17 }
 0x383   : > { %v1178_v43 = vpop.permute.xlu2 %1177 }
 0x384   : > { %v1190_v38 = vmul.f32 %v1178_v43, %v3593_v40  ;;  %v1191_v46 = vmul.f32 %v1178_v43, %v3595_v41 }
 0x386   : > { %1208 = vrot.lane.b32.xlu1 %v1190_v38, %s3124_s17  ;;  %1210 = vrot.lane.b32.xlu2 %v1191_v46, %s3124_s17 }
 0x38b   : > { %v1255_v30 = vpop.permute.xlu2 %1254 }
 0x38c   : > { %v1267_v34 = vmul.f32 %v1255_v30, %v3593_v40  ;;  %v1268_v51 = vmul.f32 %v1255_v30, %v3595_v41 }
 0x393   : > { %v1332_v58 = vpop.permute.xlu2 %1331 }
 0x394   : > { %v3601_v47 = vpop.permute.xlu1 %1136  ;;  %v3603_v48 = vpop.permute.xlu0 %1128  ;;  %v1344_v42 = vmul.f32 %v1332_v58, %v3593_v40  ;;  %v1345_v0 = vmul.f32 %v1332_v58, %v3595_v41 }
 0x395   : > { %v1143_v15 = vmul.f32 %v3603_v48, %v3585_v5  ;;  %v1144_v43 = vmul.f32 %v3603_v48, %v3587_v32 }
 0x39b   : > { %v1409_v36 = vpop.permute.xlu2 %1408 }
 0x39c   : > { %v3605_v35 = vpop.permute.xlu1 %1140  ;;  %v3607_v49 = vpop.permute.xlu0 %1132  ;;  %v1421_v16 = vmul.f32 %v1409_v36, %v3593_v40  ;;  %v1422_v27 = vmul.f32 %v1409_v36, %v3595_v41 }
 0x39d   : > { %v1146_v25 = vmul.f32 %v3607_v49, %v3595_v41 }
 0x3a4   : > { %v1186_v55 = vpop.permute.xlu1 %1185  ;;  %v1182_v63 = vpop.permute.xlu0 %1181 }
 0x3a5   : > { %v1194_v60 = vmul.f32 %v1186_v55, %v3609_v59  ;;  %v1192_v62 = vmul.f32 %v1182_v63, %v3611_v56  ;;  %v1193_v2 = vmul.f32 %v1182_v63, %v3613_v57  ;;  %v1195_v4 = vmul.f32 %v1186_v55, %v3621_v50  ;;  %v3000_v55 = vld [vmem:[%s4171_s2 + $0x15] ss:$0 sm:$0xff] }
 0x3a6   : > { %v1145_v63 = vmul.f32 %v3607_v49, %v3593_v40  ;;  %v1147_v49 = vmul.f32 %v3601_v47, %v3611_v56 }
 0x3a7   : > { %1216 = vrot.lane.b32.xlu2 %v1194_v60, %s3124_s17  ;;  %1214 = vrot.lane.b32.xlu1 %v1193_v2, %s3124_s17  ;;  %v3001_v2 = vld [vmem:[%s4171_s2 + $0x16] ss:$0 sm:$0xff] }
 0x3a8   : > { %1212 = vrot.lane.b32.xlu0 %v1192_v62, %s3124_s17 }
 0x3ac   : > { %v1251_v44 = vpop.permute.xlu1 %1250  ;;  %v1259_v10 = vpop.permute.xlu0 %1258 }
 0x3ad   : > { %v1265_v3 = vmul.f32 %v1251_v44, %v3585_v5  ;;  %v1266_v53 = vmul.f32 %v1251_v44, %v3587_v32  ;;  %v1270_v6 = vmul.f32 %v1259_v10, %v3613_v57  ;;  %v1269_v12 = vmul.f32 %v1259_v10, %v3611_v56 }
 0x3ae   : > { %v1149_v44 = vmul.f32 %v3605_v35, %v3609_v59 }
 0x3af   : > { %1281 = vrot.lane.b32.xlu2 %v1265_v3, %s3125_s21  ;;  %1285 = vrot.lane.b32.xlu1 %v1267_v34, %s3125_s21 }
 0x3b0   : > { %1218 = vrot.lane.b32.xlu0 %v1195_v4, %s3124_s17  ;;  %s3132_s17 = smov 119  }
 0x3b4   : > { %v1263_v61 = vpop.permute.xlu1 %1262  ;;  %v1336_v7 = vpop.permute.xlu0 %1335 }
 0x3b5   : > { %v1271_v11 = vmul.f32 %v1263_v61, %v3609_v59  ;;  %v1272_v14 = vmul.f32 %v1263_v61, %v3621_v50  ;;  %v1347_v29 = vmul.f32 %v1336_v7, %v3613_v57  ;;  %v1346_v54 = vmul.f32 %v1336_v7, %v3611_v56 }
 0x3b7   : > { %1287 = vrot.lane.b32.xlu2 %v1268_v51, %s3125_s21  ;;  %1291 = vrot.lane.b32.xlu1 %v1270_v6, %s3125_s21 }
 0x3b8   : > { %1283 = vrot.lane.b32.xlu0 %v1266_v53, %s3125_s21  ;;  %v1148_v53 = vmul.f32 %v3601_v47, %v3613_v57 }
 0x3bc   : > { %v1328_v52 = vpop.permute.xlu1 %1327  ;;  %v1413_v18 = vpop.permute.xlu0 %1412 }
 0x3bd   : > { %v1342_v13 = vmul.f32 %v1328_v52, %v3585_v5  ;;  %v1343_v9 = vmul.f32 %v1328_v52, %v3587_v32  ;;  %v1424_v21 = vmul.f32 %v1413_v18, %v3613_v57  ;;  %v1423_v39 = vmul.f32 %v1413_v18, %v3611_v56 }
 0x3be   : > { %v1150_v52 = vmul.f32 %v3605_v35, %v3621_v50 }
 0x3bf   : > { %1293 = vrot.lane.b32.xlu2 %v1271_v11, %s3125_s21  ;;  %1362 = vrot.lane.b32.xlu1 %v1344_v42, %s3126_s18 }
 0x3c0   : > { %1289 = vrot.lane.b32.xlu0 %v1269_v12, %s3125_s21 }
 0x3c4   : > { %v1340_v17 = vpop.permute.xlu1 %1339 }
 0x3c5   : > { %v1348_v19 = vmul.f32 %v1340_v17, %v3609_v59  ;;  %v1349_v24 = vmul.f32 %v1340_v17, %v3621_v50 }
 0x3c7   : > { %1358 = vrot.lane.b32.xlu2 %v1342_v13, %s3126_s18  ;;  %1368 = vrot.lane.b32.xlu1 %v1347_v29, %s3126_s18 }
 0x3c8   : > { %1295 = vrot.lane.b32.xlu0 %v1272_v14, %s3125_s21 }
 0x3cc   : > { %v1405_v22 = vpop.permute.xlu1 %1404 }
 0x3cd   : > { %v1419_v23 = vmul.f32 %v1405_v22, %v3585_v5  ;;  %v1420_v31 = vmul.f32 %v1405_v22, %v3587_v32 }
 0x3cf   : > { %1364 = vrot.lane.b32.xlu2 %v1345_v0, %s3126_s18  ;;  %1439 = vrot.lane.b32.xlu1 %v1421_v16, %s3127_s20 }
 0x3d0   : > { %1360 = vrot.lane.b32.xlu0 %v1343_v9, %s3126_s18 }
 0x3d4   : > { %v1417_v33 = vpop.permute.xlu1 %1416 }
 0x3d5   : > { %v1425_v37 = vmul.f32 %v1417_v33, %v3609_v59  ;;  %v1426_v60 = vmul.f32 %v1417_v33, %v3621_v50 }
 0x3d7   : > { %1370 = vrot.lane.b32.xlu2 %v1348_v19, %s3126_s18  ;;  %1445 = vrot.lane.b32.xlu1 %v1424_v21, %s3127_s20 }
 0x3d8   : > { %1366 = vrot.lane.b32.xlu0 %v1346_v54, %s3126_s18  ;;  %v1205_v20 = vpop.permute.xlu2 %1204 }
 0x3d9   : > { %v1228_v1 = vadd.f32 %v1205_v20, %v1143_v15 }
 0x3df   : > { %1435 = vrot.lane.b32.xlu2 %v1419_v23, %s3127_s20  ;;  %1481 = vperm.xlu1 %2976, %v2998_v45  }
 0x3e0   : > { %1372 = vrot.lane.b32.xlu0 %v1349_v24, %s3126_s18  ;;  %v1211_v8 = vpop.permute.xlu2 %1210 }
 0x3e1   : > { %v1231_v26 = vadd.f32 %v1211_v8, %v1146_v25 }
 0x3e7   : > { %1441 = vrot.lane.b32.xlu2 %v1422_v27, %s3127_s20  ;;  %1493 = vperm.xlu1 %2976, %v2999_v28  }
 0x3e8   : > { %1437 = vrot.lane.b32.xlu0 %v1420_v31, %s3127_s20 }
 0x3ef   : > { %1447 = vrot.lane.b32.xlu2 %v1425_v37, %s3127_s20 }
 0x3f0   : > { %1443 = vrot.lane.b32.xlu0 %v1423_v39, %s3127_s20  ;;  %v1207_v38 = vpop.permute.xlu0 %1206 }
 0x3f1   : > { %v1229_v46 = vadd.f32 %v1207_v38, %v1144_v43 }
 0x3f7   : > { %1485 = vperm.xlu2 %2977, %v3000_v55  }
 0x3f8   : > { %1449 = vrot.lane.b32.xlu0 %v1426_v60, %s3127_s20  ;;  %v1209_v62 = vpop.permute.xlu1 %1208 }
 0x3f9   : > { %v1230_v48 = vadd.f32 %v1209_v62, %v1145_v63 }
 0x400   : > { %1489 = vperm.xlu0 %2975, %v3001_v2  }
 0x401   : > { %v1217_v30 = vpop.permute.xlu2 %1216 }
 0x402   : > { %v1234_v3 = vadd.f32 %v1217_v30, %v1149_v44 }
 0x409   : > { %v1282_v34 = vpop.permute.xlu2 %1281 }
 0x40a   : > { %v1305_v4 = vadd.f32 %v1282_v34, %v1228_v1 }
 0x411   : > { %v1288_v10 = vpop.permute.xlu2 %1287 }
 0x412   : > { %v1308_v51 = vadd.f32 %v1288_v10, %v1231_v26 }
 0x419   : > { %v1294_v6 = vpop.permute.xlu2 %1293  ;;  %v1215_v61 = vpop.permute.xlu1 %1214 }
 0x41a   : > { %v1213_v58 = vpop.permute.xlu0 %1212  ;;  %v1311_v11 = vadd.f32 %v1294_v6, %v1234_v3  ;;  %v1233_v42 = vadd.f32 %v1215_v61, %v1148_v53  ;;  %v3002_v61 = vld [vmem:[%s4171_s2 + $0x19] ss:$0 sm:$0xff] }
 0x41b   : > { %v1232_v12 = vadd.f32 %v1213_v58, %v1147_v49 }
 0x421   : > { %v1359_v7 = vpop.permute.xlu2 %1358  ;;  %v1286_v13 = vpop.permute.xlu1 %1285 }
 0x422   : > { %v1219_v14 = vpop.permute.xlu0 %1218  ;;  %v1382_v29 = vadd.f32 %v1359_v7, %v1305_v4  ;;  %v1307_v36 = vadd.f32 %v1286_v13, %v1230_v48  ;;  %v3003_v7 = vld [vmem:[%s4171_s2 + $0x18] ss:$0 sm:$0xff] }
 0x423   : > { %v1235_v0 = vadd.f32 %v1219_v14, %v1150_v52  ;;  %v3004_v14 = vld [vmem:[%s4171_s2 + $0x1a] ss:$0 sm:$0xff] }
 0x429   : > { %v1365_v16 = vpop.permute.xlu2 %1364  ;;  %v1292_v9 = vpop.permute.xlu1 %1291 }
 0x42a   : > { %v1284_v17 = vpop.permute.xlu0 %1283  ;;  %v1385_v18 = vadd.f32 %v1365_v16, %v1308_v51  ;;  %v1310_v47 = vadd.f32 %v1292_v9, %v1233_v42 }
 0x42b   : > { %v1306_v19 = vadd.f32 %v1284_v17, %v1229_v46 }
 0x431   : > { %v1371_v54 = vpop.permute.xlu2 %1370  ;;  %v1363_v21 = vpop.permute.xlu1 %1362 }
 0x432   : > { %v1290_v15 = vpop.permute.xlu0 %1289  ;;  %v1388_v20 = vadd.f32 %v1371_v54, %v1311_v11  ;;  %v1384_v1 = vadd.f32 %v1363_v21, %v1307_v36 }
 0x433   : > { %v1309_v22 = vadd.f32 %v1290_v15, %v1232_v12 }
 0x439   : > { %v1436_v45 = vpop.permute.xlu2 %1435  ;;  %v1369_v35 = vpop.permute.xlu1 %1368 }
 0x43a   : > { %v1296_v23 = vpop.permute.xlu0 %1295  ;;  %v1459_v24 = vadd.f32 %v1436_v45, %v1382_v29  ;;  %v1387_v25 = vadd.f32 %v1369_v35, %v1310_v47  ;;  %v3005_v29 = vld [vmem:[%s4171_s2 + $0x1b] ss:$0 sm:$0xff] }
 0x43b   : > { %v1312_v8 = vadd.f32 %v1296_v23, %v1235_v0 }
 0x441   : > { %v1442_v26 = vpop.permute.xlu2 %1441  ;;  %v1440_v28 = vpop.permute.xlu1 %1439 }
 0x442   : > { %v1361_v27 = vpop.permute.xlu0 %1360  ;;  %v1462_v31 = vadd.f32 %v1442_v26, %v1385_v18  ;;  %v1461_v33 = vadd.f32 %v1440_v28, %v1384_v1 }
 0x443   : > { %v1383_v37 = vadd.f32 %v1361_v27, %v1306_v19 }
 0x449   : > { %v1448_v39 = vpop.permute.xlu2 %1447  ;;  %v1446_v43 = vpop.permute.xlu1 %1445 }
 0x44a   : > { %v1367_v38 = vpop.permute.xlu0 %1366  ;;  %v1465_v46 = vadd.f32 %v1448_v39, %v1388_v20  ;;  %v1464_v55 = vadd.f32 %v1446_v43, %v1387_v25  ;;  %v3006_v39 = vld [vmem:[%s4171_s2 + $0x1c] ss:$0 sm:$0xff] }
 0x44b   : > { %v1386_v60 = vadd.f32 %v1367_v38, %v1309_v22 }
 0x451   : > { %v1486_v63 = vpop.permute.xlu2 %1485  ;;  %v1482_v62 = vpop.permute.xlu1 %1481 }
 0x452   : > { %v1373_v48 = vpop.permute.xlu0 %1372  ;;  %v1498_v2 = vmul.f32 %v1486_v63, %v3593_v40  ;;  %v1496_v44 = vmul.f32 %v1482_v62, %v3585_v5  ;;  %v1497_v30 = vmul.f32 %v1482_v62, %v3587_v32  ;;  %v1499_v4 = vmul.f32 %v1486_v63, %v3595_v41 }
 0x453   : > { %v1389_v3 = vadd.f32 %v1373_v48, %v1312_v8 }
 0x454   : > { %1516 = vrot.lane.b32.xlu1 %v1498_v2, %s3128_s13  ;;  %1514 = vrot.lane.b32.xlu0 %v1497_v30, %s3128_s13 }
 0x455   : > { %1512 = vrot.lane.b32.xlu2 %v1496_v44, %s3128_s13 }
 0x459   : > { %v1494_v51 = vpop.permute.xlu1 %1493 }
 0x45a   : > { %v1438_v34 = vpop.permute.xlu0 %1437  ;;  %v1502_v53 = vmul.f32 %v1494_v51, %v3609_v59  ;;  %v1503_v13 = vmul.f32 %v1494_v51, %v3621_v50 }
 0x45b   : > { %v1460_v10 = vadd.f32 %v1438_v34, %v1383_v37 }
 0x45d   : > { %1518 = vrot.lane.b32.xlu2 %v1499_v4, %s3128_s13 }
 0x462   : > { %v1444_v49 = vpop.permute.xlu0 %1443 }
 0x463   : > { %v1463_v6 = vadd.f32 %v1444_v49, %v1386_v60  ;;  %v3009_v60 = vld [vmem:[%s4171_s2 + $0x1f] ss:$0 sm:$0xff] }
 0x465   : > { %1524 = vrot.lane.b32.xlu2 %v1502_v53, %s3128_s13 }
 0x46a   : > { %v1450_v58 = vpop.permute.xlu0 %1449 }
 0x46b   : > { %v1466_v11 = vadd.f32 %v1450_v58, %v1389_v3 }
 0x46d   : > { %1562 = vperm.xlu2 %2977, %v3002_v61  }
 0x472   : > { %v1490_v42 = vpop.permute.xlu0 %1489 }
 0x473   : > { %v1500_v12 = vmul.f32 %v1490_v42, %v3611_v56  ;;  %v1501_v52 = vmul.f32 %v1490_v42, %v3613_v57 }
 0x475   : > { %1520 = vrot.lane.b32.xlu0 %v1500_v12, %s3128_s13  ;;  %1522 = vrot.lane.b32.xlu1 %v1501_v52, %s3128_s13 }
 0x47d   : > { %1526 = vrot.lane.b32.xlu0 %v1503_v13, %s3128_s13  ;;  %1558 = vperm.xlu1 %2976, %v3003_v7  }
 0x485   : > { %1566 = vperm.xlu0 %2975, %v3004_v14   ;;  %1570 = vperm.xlu1 %2976, %v3005_v29  }
 0x4af   : > { %v1513_v36 = vpop.permute.xlu2 %1512 }
 0x4b0   : > { %v1536_v0 = vadd.f32 %v1513_v36, %v1459_v24 }
 0x4b7   : > { %v1519_v16 = vpop.permute.xlu2 %1518 }
 0x4b8   : > { %v1539_v9 = vadd.f32 %v1519_v16, %v1462_v31  ;;  %v3010_v16 = vld [vmem:[%s4171_s2 + $0x20] ss:$0 sm:$0xff] }
 0x4bf   : > { %v1525_v17 = vpop.permute.xlu2 %1524 }
 0x4c0   : > { %v1542_v18 = vadd.f32 %v1525_v17, %v1465_v46  ;;  %v3007_v46 = vld [vmem:[%s4171_s2 + $0x1e] ss:$0 sm:$0xff] }
 0x4c6   : > { %v1517_v47 = vpop.permute.xlu1 %1516  ;;  %v1515_v19 = vpop.permute.xlu0 %1514 }
 0x4c7   : > { %v1538_v54 = vadd.f32 %v1517_v47, %v1461_v33  ;;  %v1563_v21 = vpop.permute.xlu2 %1562  ;;  %v1537_v15 = vadd.f32 %v1515_v19, %v1460_v10  ;;  %v3011_v47 = vld [vmem:[%s4171_s2 + $0x22] ss:$0 sm:$0xff]  ;;  %v3012_v19 = vld [vmem:[%s4171_s2 + $0x21] ss:$0 sm:$0xff] }
 0x4c8   : > { %v1575_v20 = vmul.f32 %v1563_v21, %v3593_v40  ;;  %v1576_v27 = vmul.f32 %v1563_v21, %v3595_v41 }
 0x4ca   : > { %1593 = vrot.lane.b32.xlu1 %v1575_v20, %s3129_s25 }
 0x4e7   : > { %v1521_v1 = vpop.permute.xlu0 %1520  ;;  %v1523_v22 = vpop.permute.xlu1 %1522 }
 0x4e8   : > { %v1540_v45 = vadd.f32 %v1521_v1, %v1463_v6  ;;  %v1541_v35 = vadd.f32 %v1523_v22, %v1464_v55  ;;  %v3008_v55 = vld [vmem:[%s4171_s2 + $0x1d] ss:$0 sm:$0xff] }
 0x4ef   : > { %v1527_v23 = vpop.permute.xlu0 %1526  ;;  %v1559_v25 = vpop.permute.xlu1 %1558 }
 0x4f0   : > { %v1543_v24 = vadd.f32 %v1527_v23, %v1466_v11  ;;  %v1573_v8 = vmul.f32 %v1559_v25, %v3585_v5  ;;  %v1574_v26 = vmul.f32 %v1559_v25, %v3587_v32 }
 0x4f2   : > { %1591 = vrot.lane.b32.xlu0 %v1574_v26, %s3129_s25  ;;  %1589 = vrot.lane.b32.xlu2 %v1573_v8, %s3129_s25 }
 0x4f7   : > { %v1567_v28 = vpop.permute.xlu0 %1566  ;;  %v1571_v37 = vpop.permute.xlu1 %1570 }
 0x4f8   : > { %v1577_v31 = vmul.f32 %v1567_v28, %v3611_v56  ;;  %v1578_v33 = vmul.f32 %v1567_v28, %v3613_v57  ;;  %v1579_v43 = vmul.f32 %v1571_v37, %v3609_v59  ;;  %v1580_v38 = vmul.f32 %v1571_v37, %v3621_v50 }
 0x4fa   : > { %1597 = vrot.lane.b32.xlu0 %v1577_v31, %s3129_s25  ;;  %1595 = vrot.lane.b32.xlu2 %v1576_v27, %s3129_s25 }
 0x4fb   : > { %1599 = vrot.lane.b32.xlu1 %v1578_v33, %s3129_s25 }
 0x502   : > { %1603 = vrot.lane.b32.xlu0 %v1580_v38, %s3129_s25  ;;  %1601 = vrot.lane.b32.xlu2 %v1579_v43, %s3129_s25 }
 0x503   : > { %1635 = vperm.xlu1 %2976, %v3006_v39  }
 0x50a   : > { %1643 = vperm.xlu0 %2975, %v3007_v46   ;;  %1639 = vperm.xlu2 %2977, %v3008_v55  }
 0x50b   : > { %1647 = vperm.xlu1 %2976, %v3009_v60  }
 0x53c   : > { %v1594_v63 = vpop.permute.xlu1 %1593 }
 0x53d   : > { %v1615_v62 = vadd.f32 %v1594_v63, %v1538_v54 }
 0x54c   : > { %v1590_v48 = vpop.permute.xlu2 %1589 }
 0x54d   : > { %v1613_v2 = vadd.f32 %v1590_v48, %v1536_v0  ;;  %v3014_v48 = vld [vmem:[%s4171_s2 + $0x24] ss:$0 sm:$0xff] }
 0x554   : > { %v1596_v44 = vpop.permute.xlu2 %1595 }
 0x555   : > { %v1616_v30 = vadd.f32 %v1596_v44, %v1539_v9 }
 0x55c   : > { %v1602_v3 = vpop.permute.xlu2 %1601 }
 0x55d   : > { %v1619_v34 = vadd.f32 %v1602_v3, %v1542_v18  ;;  %v3013_v18 = vld [vmem:[%s4171_s2 + $0x23] ss:$0 sm:$0xff]  ;;  %v3015_v3 = vld [vmem:[%s4171_s2 + $0x26] ss:$0 sm:$0xff] }
 0x564   : > { %v1592_v4 = vpop.permute.xlu0 %1591  ;;  %v1640_v10 = vpop.permute.xlu2 %1639 }
 0x565   : > { %v1614_v51 = vadd.f32 %v1592_v4, %v1537_v15  ;;  %v1652_v49 = vmul.f32 %v1640_v10, %v3593_v40  ;;  %v1653_v36 = vmul.f32 %v1640_v10, %v3595_v41 }
 0x567   : > { %1670 = vrot.lane.b32.xlu1 %v1652_v49, %s3130_s15 }
 0x56c   : > { %v1598_v53 = vpop.permute.xlu0 %1597 }
 0x56d   : > { %v1617_v6 = vadd.f32 %v1598_v53, %v1540_v45  ;;  %v1600_v61 = vpop.permute.xlu1 %1599 }
 0x56e   : > { %v1618_v58 = vadd.f32 %v1600_v61, %v1541_v35 }
 0x574   : > { %v1604_v11 = vpop.permute.xlu0 %1603 }
 0x575   : > { %v1620_v42 = vadd.f32 %v1604_v11, %v1543_v24  ;;  %v1636_v12 = vpop.permute.xlu1 %1635 }
 0x576   : > { %v1650_v52 = vmul.f32 %v1636_v12, %v3585_v5  ;;  %v1651_v7 = vmul.f32 %v1636_v12, %v3587_v32 }
 0x578   : > { %1668 = vrot.lane.b32.xlu0 %v1651_v7, %s3130_s15  ;;  %1666 = vrot.lane.b32.xlu2 %v1650_v52, %s3130_s15  ;;  %v3018_v7 = vld [vmem:[%s4171_s2 + $0x29] ss:$0 sm:$0xff] }
 0x57c   : > { %v1644_v13 = vpop.permute.xlu0 %1643 }
 0x57d   : > { %v1654_v14 = vmul.f32 %v1644_v13, %v3611_v56  ;;  %v1655_v29 = vmul.f32 %v1644_v13, %v3613_v57  ;;  %v1648_v0 = vpop.permute.xlu1 %1647 }
 0x57e   : > { %v1656_v9 = vmul.f32 %v1648_v0, %v3609_v59  ;;  %v1657_v17 = vmul.f32 %v1648_v0, %v3621_v50 }
 0x57f   : > { %1676 = vrot.lane.b32.xlu1 %v1655_v29, %s3130_s15 }
 0x580   : > { %1674 = vrot.lane.b32.xlu0 %v1654_v14, %s3130_s15  ;;  %1672 = vrot.lane.b32.xlu2 %v1653_v36, %s3130_s15 }
 0x587   : > { %1712 = vperm.xlu1 %2976, %v3010_v16  }
 0x588   : > { %1680 = vrot.lane.b32.xlu0 %v1657_v17, %s3130_s15  ;;  %1678 = vrot.lane.b32.xlu2 %v1656_v9, %s3130_s15 }
 0x58f   : > { %1724 = vperm.xlu1 %2976, %v3013_v18  }
 0x590   : > { %1720 = vperm.xlu0 %2975, %v3011_v47   ;;  %1716 = vperm.xlu2 %2977, %v3012_v19   ;;  %v3019_v47 = vld [vmem:[%s4171_s2 + $0x28] ss:$0 sm:$0xff] }
 0x5d2   : > { %v1667_v54 = vpop.permute.xlu2 %1666 }
 0x5d3   : > { %v1690_v21 = vadd.f32 %v1667_v54, %v1613_v2 }
 0x5d9   : > { %v1671_v15 = vpop.permute.xlu1 %1670 }
 0x5da   : > { %v1692_v20 = vadd.f32 %v1671_v15, %v1615_v62  ;;  %v1673_v1 = vpop.permute.xlu2 %1672 }
 0x5db   : > { %v1693_v22 = vadd.f32 %v1673_v1, %v1616_v30  ;;  %v3016_v30 = vld [vmem:[%s4171_s2 + $0x25] ss:$0 sm:$0xff]  ;;  %v3021_v1 = vld [vmem:[%s4171_s2 + $0x2a] ss:$0 sm:$0xff] }
 0x5e2   : > { %v1679_v45 = vpop.permute.xlu2 %1678 }
 0x5e3   : > { %v1696_v35 = vadd.f32 %v1679_v45, %v1619_v34  ;;  %v3017_v34 = vld [vmem:[%s4171_s2 + $0x27] ss:$0 sm:$0xff] }
 0x5ea   : > { %v1669_v23 = vpop.permute.xlu0 %1668  ;;  %v1717_v25 = vpop.permute.xlu2 %1716 }
 0x5eb   : > { %v1691_v24 = vadd.f32 %v1669_v23, %v1614_v51  ;;  %v1729_v8 = vmul.f32 %v1717_v25, %v3593_v40  ;;  %v1730_v46 = vmul.f32 %v1717_v25, %v3595_v41 }
 0x5ed   : > { %1747 = vrot.lane.b32.xlu1 %v1729_v8, %s3131_s22 }
 0x5f1   : > { %v1677_v26 = vpop.permute.xlu1 %1676 }
 0x5f2   : > { %v1675_v28 = vpop.permute.xlu0 %1674  ;;  %v1695_v27 = vadd.f32 %v1677_v26, %v1618_v58 }
 0x5f3   : > { %v1694_v31 = vadd.f32 %v1675_v28, %v1617_v6 }
 0x5f9   : > { %v1713_v33 = vpop.permute.xlu1 %1712 }
 0x5fa   : > { %v1681_v37 = vpop.permute.xlu0 %1680  ;;  %v1727_v39 = vmul.f32 %v1713_v33, %v3585_v5  ;;  %v1728_v43 = vmul.f32 %v1713_v33, %v3587_v32 }
 0x5fb   : > { %v1697_v38 = vadd.f32 %v1681_v37, %v1620_v42 }
 0x5fc   : > { %1745 = vrot.lane.b32.xlu0 %v1728_v43, %s3131_s22  ;;  %1743 = vrot.lane.b32.xlu2 %v1727_v39, %s3131_s22 }
 0x601   : > { %v1725_v62 = vpop.permute.xlu1 %1724 }
 0x602   : > { %v1721_v55 = vpop.permute.xlu0 %1720  ;;  %v1733_v2 = vmul.f32 %v1725_v62, %v3609_v59  ;;  %v1734_v44 = vmul.f32 %v1725_v62, %v3621_v50 }
 0x603   : > { %v1731_v60 = vmul.f32 %v1721_v55, %v3611_v56  ;;  %v1732_v63 = vmul.f32 %v1721_v55, %v3613_v57 }
 0x604   : > { %1749 = vrot.lane.b32.xlu2 %v1730_v46, %s3131_s22 }
 0x605   : > { %1751 = vrot.lane.b32.xlu0 %v1731_v60, %s3131_s22  ;;  %1753 = vrot.lane.b32.xlu1 %v1732_v63, %s3131_s22 }
 0x60c   : > { %1755 = vrot.lane.b32.xlu2 %v1733_v2, %s3131_s22 }
 0x60d   : > { %1757 = vrot.lane.b32.xlu0 %v1734_v44, %s3131_s22  ;;  %1789 = vperm.xlu1 %2976, %v3014_v48  }
 0x614   : > { %1793 = vperm.xlu2 %2977, %v3016_v30  }
 0x615   : > { %1797 = vperm.xlu0 %2975, %v3015_v3   ;;  %1801 = vperm.xlu1 %2976, %v3017_v34  }
 0x656   : > { %v1744_v4 = vpop.permute.xlu2 %1743 }
 0x657   : > { %v1767_v10 = vadd.f32 %v1744_v4, %v1690_v21 }
 0x65e   : > { %v1750_v51 = vpop.permute.xlu2 %1749 }
 0x65f   : > { %v1748_v49 = vpop.permute.xlu1 %1747  ;;  %v1770_v53 = vadd.f32 %v1750_v51, %v1693_v22 }
 0x660   : > { %v1769_v6 = vadd.f32 %v1748_v49, %v1692_v20  ;;  %v3020_v20 = vld [vmem:[%s4171_s2 + $0x2b] ss:$0 sm:$0xff] }
 0x666   : > { %v1756_v61 = vpop.permute.xlu2 %1755 }
 0x667   : > { %v3773_v58 = vadd.f32 %v1756_v61, %v1696_v35 }
 0x66e   : > { %v1746_v11 = vpop.permute.xlu0 %1745  ;;  %v1794_v42 = vpop.permute.xlu2 %1793 }
 0x66f   : > { %v1768_v12 = vadd.f32 %v1746_v11, %v1691_v24  ;;  %v1806_v52 = vmul.f32 %v1794_v42, %v3593_v40  ;;  %v1807_v54 = vmul.f32 %v1794_v42, %v3595_v41 }
 0x671   : > { %1824 = vrot.lane.b32.xlu1 %v1806_v52, %s3132_s17 }
 0x677   : > { %v1752_v13 = vpop.permute.xlu0 %1751  ;;  %v1754_v14 = vpop.permute.xlu1 %1753 }
 0x678   : > { %v3780_v29 = vadd.f32 %v1752_v13, %v1694_v31  ;;  %v3782_v36 = vadd.f32 %v1754_v14, %v1695_v27 }
 0x679   : > { %1870 = vperm.xlu1 %2976, %v3018_v7  }
 0x67f   : > { %v1758_v0 = vpop.permute.xlu0 %1757  ;;  %v1790_v16 = vpop.permute.xlu1 %1789 }
 0x680   : > { %v3784_v9 = vadd.f32 %v1758_v0, %v1697_v38  ;;  %v1804_v17 = vmul.f32 %v1790_v16, %v3585_v5  ;;  %v1805_v18 = vmul.f32 %v1790_v16, %v3587_v32  ;;  %v3022_v38 = vld [vmem:[%s4172_s3] ss:$0 sm:$0xff] }
 0x682   : > { %1822 = vrot.lane.b32.xlu0 %v1805_v18, %s3132_s17  ;;  %1820 = vrot.lane.b32.xlu2 %v1804_v17, %s3132_s17 }
 0x687   : > { %v1798_v19 = vpop.permute.xlu0 %1797  ;;  %v1802_v15 = vpop.permute.xlu1 %1801 }
 0x688   : > { %v1808_v21 = vmul.f32 %v1798_v19, %v3611_v56  ;;  %v1811_v22 = vmul.f32 %v1802_v15, %v3621_v50  ;;  %v1809_v45 = vmul.f32 %v1798_v19, %v3613_v57  ;;  %v1810_v35 = vmul.f32 %v1802_v15, %v3609_v59 }
 0x68a   : > { %1866 = vperm.xlu0 %2975, %v3019_v47   ;;  %1826 = vrot.lane.b32.xlu2 %v1807_v54, %s3132_s17 }
 0x68b   : > { %1828 = vrot.lane.b32.xlu1 %v1808_v21, %s3132_s17 }
 0x692   : > { %1878 = vperm.xlu0 %2975, %v3020_v20   ;;  %1874 = vperm.xlu2 %2977, %v3021_v1  }
 0x693   : > { %1834 = vrot.lane.b32.xlu1 %v1811_v22, %s3132_s17 }
 0x69a   : > { %1832 = vrot.lane.b32.xlu0 %v1810_v35, %s3132_s17  ;;  %1830 = vrot.lane.b32.xlu2 %v1809_v45, %s3132_s17 }
 0x6dc   : > { %v1821_v23 = vpop.permute.xlu2 %1820 }
 0x6dd   : > { %v1844_v25 = vadd.f32 %v1821_v23, %v1767_v10 }
 0x6e3   : > { %v1825_v24 = vpop.permute.xlu1 %1824 }
 0x6e4   : > { %v1846_v8 = vadd.f32 %v1825_v24, %v1769_v6  ;;  %v1827_v26 = vpop.permute.xlu2 %1826 }
 0x6e5   : > { %v1847_v28 = vadd.f32 %v1827_v26, %v1770_v53 }
 0x6eb   : > { %v1871_v27 = vpop.permute.xlu1 %1870 }
 0x6ec   : > { %v1883_v31 = vmul.f32 %v1871_v27, %v3593_v40  ;;  %v1875_v33 = vpop.permute.xlu2 %1874  ;;  %v3023_v40 = vld [vmem:[%s4172_s3 + $0x3] ss:$0 sm:$0xff] }
 0x6ed   : > { %v1886_v37 = vmul.f32 %v1875_v33, %v3613_v57  ;;  %v1884_v57 = vmul.f32 %v1871_v27, %v3595_v41  ;;  %v1885_v63 = vmul.f32 %v1875_v33, %v3611_v56  ;;  %v3025_v41 = vld [vmem:[%s4172_s3 + $0x2] ss:$0 sm:$0xff] }
 0x6ee   : > { %1901 = vrot.lane.b32.xlu1 %v1883_v31, %s3133_s10 }
 0x6f4   : > { %v1823_v39 = vpop.permute.xlu0 %1822  ;;  %v1831_v2 = vpop.permute.xlu2 %1830 }
 0x6f5   : > { %v1845_v43 = vadd.f32 %v1823_v39, %v1768_v12  ;;  %v1849_v21 = vadd.f32 %v1831_v2, %v3782_v36 }
 0x6f6   : > { %1907 = vrot.lane.b32.xlu1 %v1886_v37, %s3133_s10 }
 0x6fc   : > { %v1867_v46 = vpop.permute.xlu0 %1866 }
 0x6fd   : > { %v1881_v55 = vmul.f32 %v1867_v46, %v3585_v5  ;;  %v1882_v60 = vmul.f32 %v1867_v46, %v3587_v32  ;;  %v3024_v32 = vld [vmem:[%s4172_s3 + $0x1] ss:$0 sm:$0xff]  ;;  %v1829_v56 = vpop.permute.xlu1 %1828 }
 0x6fe   : > { %1942 = vperm.xlu1 %2976, %v3022_v38  }
 0x6ff   : > { %1899 = vrot.lane.b32.xlu0 %v1882_v60, %s3133_s10  ;;  %1897 = vrot.lane.b32.xlu2 %v1881_v55, %s3133_s10 }
 0x704   : > { %v1879_v62 = vpop.permute.xlu0 %1878 }
 0x705   : > { %v1887_v48 = vmul.f32 %v1879_v62, %v3609_v59  ;;  %v1888_v5 = vmul.f32 %v1879_v62, %v3621_v50  ;;  %v1835_v44 = vpop.permute.xlu1 %1834 }
 0x706   : > { %1954 = vperm.xlu1 %2976, %v3023_v40   ;;  %v1851_v18 = vadd.f32 %v1835_v44, %v3784_v9 }
 0x707   : > { %1903 = vrot.lane.b32.xlu2 %v1884_v57, %s3133_s10  ;;  %1905 = vrot.lane.b32.xlu0 %v1885_v63, %s3133_s10 }
 0x70c   : > { %v1833_v34 = vpop.permute.xlu0 %1832 }
 0x70d   : > { %v1850_v13 = vadd.f32 %v1833_v34, %v3773_v58  ;;  %v1848_v58 = vadd.f32 %v1829_v56, %v3780_v29 }
 0x70f   : > { %1909 = vrot.lane.b32.xlu2 %v1887_v48, %s3133_s10  ;;  %1911 = vrot.lane.b32.xlu0 %v1888_v5, %s3133_s10 }
 0x717   : > { %1946 = vperm.xlu2 %2977, %v3024_v32   ;;  %1950 = vperm.xlu0 %2975, %v3025_v41  }
 0x759   : > { %v1898_v30 = vpop.permute.xlu2 %1897 }
 0x75a   : > { %v1921_v10 = vadd.f32 %v1898_v30, %v1844_v25 }
 0x760   : > { %v1902_v3 = vpop.permute.xlu1 %1901 }
 0x761   : > { %v1904_v59 = vpop.permute.xlu2 %1903  ;;  %v1923_v51 = vadd.f32 %v1902_v3, %v1846_v8 }
 0x762   : > { %v1924_v49 = vadd.f32 %v1904_v59, %v1847_v28 }
 0x768   : > { %v1908_v50 = vpop.permute.xlu1 %1907 }
 0x769   : > { %v1910_v4 = vpop.permute.xlu2 %1909  ;;  %v1926_v15 = vadd.f32 %v1908_v50, %v1849_v21 }
 0x76a   : > { %v1927_v14 = vadd.f32 %v1910_v4, %v1850_v13 }
 0x770   : > { %v1943_v53 = vpop.permute.xlu1 %1942 }
 0x771   : > { %v1900_v6 = vpop.permute.xlu0 %1899  ;;  %v1957_v61 = vadd.f32 %v1943_v53, %v1921_v10  ;;  %v1947_v11 = vpop.permute.xlu2 %1946 }
 0x772   : > { %v1922_v42 = vadd.f32 %v1900_v6, %v1845_v43  ;;  %v1959_v12 = vadd.f32 %v1947_v11, %v1923_v51  ;;  %v1960_v52 = vadd.f32 %v1947_v11, %v1924_v49 }
 0x773   : > { %1966 = vst.msk [vmem:[%s3220_s19] sm:$0xff] %vm1965_vm4, %v1957_v61 }
 0x774   : > { %v1958_v7 = vadd.f32 %v1943_v53, %v1922_v42  ;;  %1968 = vst.msk [vmem:[%s3220_s19 + $0x10] sm:$0xff] %vm1965_vm4, %v1959_v12 }
 0x775   : > { %1969 = vst.msk [vmem:[%s3220_s19 + $0x18] sm:$0xff] %vm1965_vm4, %v1960_v52 }
 0x776   : > { %1967 = vst.msk [vmem:[%s3220_s19 + $0x8] sm:$0xff] %vm1965_vm4, %v1958_v7 }
 0x778   : > { %v1955_v0 = vpop.permute.xlu1 %1954 }
 0x779   : > { %v1963_v16 = vadd.f32 %v1955_v0, %v1927_v14  ;;  %v1906_v17 = vpop.permute.xlu0 %1905 }
 0x77a   : > { %v1925_v20 = vadd.f32 %v1906_v17, %v1848_v58 }
 0x77b   : > { %1972 = vst.msk [vmem:[%s3220_s19 + $0x30] sm:$0xff] %vm1965_vm4, %v1963_v16 }
 0x781   : > { %v1912_v47 = vpop.permute.xlu0 %1911 }
 0x782   : > { %v1928_v19 = vadd.f32 %v1912_v47, %v1851_v18 }
 0x784   : > { %v1964_v54 = vadd.f32 %v1955_v0, %v1928_v19 }
 0x786   : > { %1973 = vst.msk [vmem:[%s3220_s19 + $0x38] sm:$0xff] %vm1965_vm4, %v1964_v54 }
 0x789   : > { %v1951_v1 = vpop.permute.xlu0 %1950 }
 0x78a   : > { %v1961_v22 = vadd.f32 %v1951_v1, %v1925_v20  ;;  %v1962_v45 = vadd.f32 %v1951_v1, %v1926_v15 }
 0x78c   : > { %1970 = vst.msk [vmem:[%s3220_s19 + $0x20] sm:$0xff] %vm1965_vm4, %v1961_v22 }
 0x78d   : > { %1971 = vst.msk [vmem:[%s3220_s19 + $0x28] sm:$0xff] %vm1965_vm4, %v1962_v45 }
 0x78e PF: > { %p2826_p9 = scmp.ne.s32.totalorder %s3099_s24, 2 }
 0x78f   : > { %s3135_s13 = smov (!%p2826_p9), 123  }
 0x790   : > { %1977 = sbr.rel (%p2826_p9) target bundleno = 2306 (0x902), region = 60 }
 0x795   : > { %v3029_v36 = vld [vmem:[%s4173_s4 + $0x4] ss:$0 sm:$0xff]  ;;  %v3134_v29 = vmov 0   ;;  %v3030_v9 = vld [vmem:[%s4173_s4 + $0x2] ss:$0 sm:$0xff]  ;;  %v3985_v0 = vld [vmem:[#allocation2 + $0x9] sm:$0xff] }
 0x796   : > { %3028 = vset.pattern.permute.xlu2 %v3134_v29  ;;  %3027 = vset.pattern.permute.xlu1 %v3134_v29  ;;  %v3031_v35 = vld [vmem:[%s4173_s4] ss:$0 sm:$0xff]  ;;  %v3032_v23 = vld [vmem:[%s4173_s4 + $0x5] ss:$0 sm:$0xff]  ;;  %v3033_v25 = vld [vmem:[%s4173_s4 + $0x3] ss:$0 sm:$0xff] }
 0x797   : > { %3026 = vset.pattern.permute.xlu0 %v3134_v29  ;;  %2052 = vperm.xlu2 %3028, %v3029_v36   ;;  %v3034_v24 = vld [vmem:[%s4173_s4 + $0x1] ss:$0 sm:$0xff]  ;;  %v3035_v8 = vld [vmem:[%s4173_s4 + $0x8] ss:$0 sm:$0xff]  ;;  %v3036_v26 = vld [vmem:[%s4173_s4 + $0x7] ss:$0 sm:$0xff] }
 0x798   : > { %2007 = vperm.xlu1 %3027, %v3030_v9   ;;  %1999 = vperm.xlu0 %3026, %v3031_v35   ;;  %v3037_v28 = vld [vmem:[%s4173_s4 + $0x6] ss:$0 sm:$0xff]  ;;  %v3038_v27 = vld [vmem:[%s4173_s4 + $0xb] ss:$0 sm:$0xff]  ;;  %v3039_v31 = vld [vmem:[%s4173_s4 + $0xa] ss:$0 sm:$0xff] }
 0x799   : > { %v3040_v33 = vld [vmem:[%s4173_s4 + $0x9] ss:$0 sm:$0xff]  ;;  %v3041_v37 = vld [vmem:[%s4173_s4 + $0xe] ss:$0 sm:$0xff]  ;;  %v3042_v39 = vld [vmem:[%s4173_s4 + $0xd] ss:$0 sm:$0xff] }
 0x79a   : > { %v3043_v43 = vld [vmem:[%s4173_s4 + $0xc] ss:$0 sm:$0xff]  ;;  %v3044_v38 = vld [vmem:[%s4173_s4 + $0x11] ss:$0 sm:$0xff]  ;;  %v3045_v46 = vld [vmem:[%s4173_s4 + $0x10] ss:$0 sm:$0xff] }
 0x79b   : > { %v3046_v55 = vld [vmem:[%s4173_s4 + $0xf] ss:$0 sm:$0xff]  ;;  %v3047_v60 = vld [vmem:[%s4173_s4 + $0x14] ss:$0 sm:$0xff]  ;;  %v3048_v40 = vld [vmem:[%s4173_s4 + $0x13] ss:$0 sm:$0xff] }
 0x79c   : > { %v3049_v57 = vld [vmem:[%s4173_s4 + $0x12] ss:$0 sm:$0xff]  ;;  %v3050_v63 = vld [vmem:[%s4173_s4 + $0x17] ss:$0 sm:$0xff]  ;;  %v3051_v62 = vld [vmem:[%s4173_s4 + $0x16] ss:$0 sm:$0xff] }
 0x79d   : > { %v3052_v48 = vld [vmem:[%s4173_s4 + $0x15] ss:$0 sm:$0xff]  ;;  %v3053_v5 = vld [vmem:[%s4173_s4 + $0x1a] ss:$0 sm:$0xff]  ;;  %v3054_v32 = vld [vmem:[%s4173_s4 + $0x19] ss:$0 sm:$0xff] }
 0x79e   : > { %v3055_v41 = vld [vmem:[%s4173_s4 + $0x18] ss:$0 sm:$0xff]  ;;  %v3056_v56 = vld [vmem:[%s4173_s4 + $0x1d] ss:$0 sm:$0xff]  ;;  %v3057_v2 = vld [vmem:[%s4173_s4 + $0x1c] ss:$0 sm:$0xff] }
 0x79f   : > { %2056 = vperm.xlu2 %3028, %v3032_v23   ;;  %v3058_v44 = vld [vmem:[%s4173_s4 + $0x1b] ss:$0 sm:$0xff]  ;;  %v3059_v30 = vld [vmem:[%s4173_s4 + $0x20] ss:$0 sm:$0xff]  ;;  %v3060_v3 = vld [vmem:[%s4173_s4 + $0x1f] ss:$0 sm:$0xff] }
 0x7a0   : > { %2011 = vperm.xlu1 %3027, %v3033_v25   ;;  %2003 = vperm.xlu0 %3026, %v3034_v24   ;;  %v3061_v59 = vld [vmem:[%s4173_s4 + $0x1e] ss:$0 sm:$0xff]  ;;  %v3062_v50 = vld [vmem:[%s4173_s4 + $0x23] ss:$0 sm:$0xff]  ;;  %v3063_v34 = vld [vmem:[%s4173_s4 + $0x22] ss:$0 sm:$0xff] }
 0x7a1   : > { %v3064_v4 = vld [vmem:[%s4173_s4 + $0x21] ss:$0 sm:$0xff]  ;;  %v3065_v51 = vld [vmem:[%s4173_s4 + $0x26] ss:$0 sm:$0xff]  ;;  %v3066_v49 = vld [vmem:[%s4173_s4 + $0x25] ss:$0 sm:$0xff] }
 0x7a2   : > { %v3067_v53 = vld [vmem:[%s4173_s4 + $0x24] ss:$0 sm:$0xff]  ;;  %v3068_v61 = vld [vmem:[%s4173_s4 + $0x29] ss:$0 sm:$0xff]  ;;  %v3069_v11 = vld [vmem:[%s4173_s4 + $0x28] ss:$0 sm:$0xff] }
 0x7a3   : > { %v3070_v42 = vld [vmem:[%s4173_s4 + $0x27] ss:$0 sm:$0xff]  ;;  %v3071_v52 = vld [vmem:[%s4174_s5] ss:$0 sm:$0xff]  ;;  %v3072_v7 = vld [vmem:[%s4173_s4 + $0x2b] ss:$0 sm:$0xff] }
 0x7a4   : > { %v3073_v13 = vld [vmem:[%s4173_s4 + $0x2a] ss:$0 sm:$0xff]  ;;  %v2030_v14 = vld [vmem:[#allocation2 + $0x1] sm:$0xff]  ;;  %vm2628_vm5 = vcmask 130048  }
 0x7a5   : > { %v1978_v17 = vld [vmem:[#allocation2] sm:$0xff]  ;;  %v3987_v18 = vld [vmem:[#allocation2 + $0x8] sm:$0xff] }
 0x7a6   : > { %v2083_v21 = vld [vmem:[#allocation2 + $0x2] sm:$0xff]  ;;  %v3990_v58 = vld [vmem:[#allocation2 + $0xa] sm:$0xff]  ;;  %v3076_v36 = vld [vmem:[%s4174_s5 + $0x1] ss:$0 sm:$0xff] }
 0x7a7   : > { %2105 = vperm.xlu2 %3028, %v3035_v8   ;;  %v3074_v20 = vld [vmem:[%s4174_s5 + $0x3] ss:$0 sm:$0xff]  ;;  %v3075_v45 = vld [vmem:[%s4174_s5 + $0x2] ss:$0 sm:$0xff] }
 0x7a8   : > { %2064 = vperm.xlu1 %3027, %v3036_v26   ;;  %2060 = vperm.xlu0 %3026, %v3037_v28   ;;  %v2032_v25 = vld [vmem:[#allocation2 + $0x21] sm:$0xff]  ;;  %v4007_v26 = vld [vmem:[#allocation2 + $0x29] sm:$0xff] }
 0x7a9   : > { %v1980_v28 = vld [vmem:[#allocation2 + $0x20] sm:$0xff] }
 0x7af   : > { %2117 = vperm.xlu2 %3028, %v3038_v27   ;;  %v4009_v27 = vld [vmem:[#allocation2 + $0x28] sm:$0xff] }
 0x7b0   : > { %2113 = vperm.xlu1 %3027, %v3039_v31   ;;  %2109 = vperm.xlu0 %3026, %v3040_v33  }
 0x7b7   : > { %2166 = vperm.xlu2 %3028, %v3041_v37  }
 0x7b8   : > { %2162 = vperm.xlu1 %3027, %v3042_v39   ;;  %2158 = vperm.xlu0 %3026, %v3043_v43  }
 0x7bf   : > { %2215 = vperm.xlu2 %3028, %v3044_v38  }
 0x7c0   : > { %2211 = vperm.xlu1 %3027, %v3045_v46   ;;  %2170 = vperm.xlu0 %3026, %v3046_v55  }
 0x7c7   : > { %2264 = vperm.xlu2 %3028, %v3047_v60  }
 0x7c8   : > { %2223 = vperm.xlu1 %3027, %v3048_v40   ;;  %2219 = vperm.xlu0 %3026, %v3049_v57   ;;  %v1982_v40 = vld [vmem:[#allocation2 + $0x40] sm:$0xff] }
 0x7c9   : > { %v1984_v57 = vld [vmem:[#allocation2 + $0x60] sm:$0xff] }
 0x7cf   : > { %2276 = vperm.xlu2 %3028, %v3050_v63   ;;  %v4013_v63 = vld [vmem:[#allocation2 + $0x68] sm:$0xff] }
 0x7d0   : > { %2272 = vperm.xlu1 %3027, %v3051_v62   ;;  %2268 = vperm.xlu0 %3026, %v3052_v48   ;;  %v2036_v62 = vld [vmem:[#allocation2 + $0x61] sm:$0xff]  ;;  %v4015_v48 = vld [vmem:[#allocation2 + $0x69] sm:$0xff] }
 0x7d7   : > { %2325 = vperm.xlu2 %3028, %v3053_v5   ;;  %v4017_v5 = vld [vmem:[#allocation2 + $0x48] sm:$0xff] }
 0x7d8   : > { %2321 = vperm.xlu1 %3027, %v3054_v32   ;;  %2317 = vperm.xlu0 %3026, %v3055_v41   ;;  %v2034_v32 = vld [vmem:[#allocation2 + $0x41] sm:$0xff]  ;;  %v4019_v41 = vld [vmem:[#allocation2 + $0x49] sm:$0xff] }
 0x7df   : > { %2374 = vperm.xlu2 %3028, %v3056_v56   ;;  %v2089_v56 = vld [vmem:[#allocation2 + $0x62] sm:$0xff] }
 0x7e0   : > { %2370 = vperm.xlu1 %3027, %v3057_v2   ;;  %2329 = vperm.xlu0 %3026, %v3058_v44   ;;  %v4021_v2 = vld [vmem:[#allocation2 + $0x6a] sm:$0xff] }
 0x7e7   : > { %2423 = vperm.xlu2 %3028, %v3059_v30  }
 0x7e8   : > { %2382 = vperm.xlu1 %3027, %v3060_v3   ;;  %2378 = vperm.xlu0 %3026, %v3061_v59  }
 0x7ef   : > { %2435 = vperm.xlu2 %3028, %v3062_v50  }
 0x7f0   : > { %2431 = vperm.xlu1 %3027, %v3063_v34   ;;  %2427 = vperm.xlu0 %3026, %v3064_v4  }
 0x7f1   : > { %v2053_v10 = vpop.permute.xlu2 %2052 }
 0x7f2   : > { %v2067_v47 = vmul.f32 %v2053_v10, %v2030_v14  ;;  %v2068_v19 = vmul.f32 %v2053_v10, %v3985_v0  ;;  %v2087_v14 = vld [vmem:[#allocation2 + $0x42] sm:$0xff] }
 0x7f7   : > { %2484 = vperm.xlu2 %3028, %v3065_v51  }
 0x7f8   : > { %2480 = vperm.xlu1 %3027, %v3066_v49   ;;  %2476 = vperm.xlu0 %3026, %v3067_v53  }
 0x7f9   : > { %v2057_v6 = vpop.permute.xlu2 %2056 }
 0x7fa   : > { %v2069_v39 = vmul.f32 %v2057_v6, %v2032_v25  ;;  %v2070_v43 = vmul.f32 %v2057_v6, %v4007_v26 }
 0x7ff   : > { %2533 = vperm.xlu2 %3028, %v3068_v61  }
 0x800   : > { %2529 = vperm.xlu1 %3027, %v3069_v11   ;;  %2488 = vperm.xlu0 %3026, %v3070_v42  }
 0x801   : > { %v2106_v12 = vpop.permute.xlu2 %2105 }
 0x802   : > { %v2120_v29 = vmul.f32 %v2106_v12, %v2083_v21  ;;  %v2121_v9 = vmul.f32 %v2106_v12, %v3990_v58  ;;  %v2141_v21 = vld [vmem:[#allocation2 + $0x4b] sm:$0xff] }
 0x807   : > { %2573 = vperm.xlu2 %3028, %v3071_v52  }
 0x808   : > { %2541 = vperm.xlu1 %3027, %v3072_v7   ;;  %2537 = vperm.xlu0 %3026, %v3073_v13  }
 0x809   : > { %v2118_v16 = vpop.permute.xlu2 %2117 }
 0x80a   : > { %v2008_v54 = vpop.permute.xlu1 %2007  ;;  %v2000_v15 = vpop.permute.xlu0 %1999  ;;  %v2126_v6 = vmul.f32 %v2118_v16, %v2089_v56  ;;  %v2127_v61 = vmul.f32 %v2118_v16, %v4021_v2 }
 0x80b   : > { %v2014_v1 = vmul.f32 %v2000_v15, %v1978_v17  ;;  %v2015_v22 = vmul.f32 %v2000_v15, %v3987_v18  ;;  %v2018_v4 = vmul.f32 %v2008_v54, %v1982_v40  ;;  %v2019_v10 = vmul.f32 %v2008_v54, %v4017_v5  ;;  %v4028_v17 = vld [vmem:[#allocation2 + $0x4a] sm:$0xff] }
 0x80c   : > { %v2140_v54 = vld [vmem:[#allocation2 + $0x43] sm:$0xff] }
 0x80d   : > { %v2075_v35 = vadd.f32 %v2067_v47, %v2014_v1  ;;  %v2076_v23 = vadd.f32 %v2068_v19, %v2015_v22  ;;  %v2085_v47 = vld [vmem:[#allocation2 + $0x22] sm:$0xff]  ;;  %v4030_v19 = vld [vmem:[#allocation2 + $0x2a] sm:$0xff] }
 0x80f   : > { %2585 = vperm.xlu2 %3028, %v3074_v20   ;;  %v4003_v24 = vadd.f32 %v2120_v29, %v2075_v35  ;;  %v4005_v8 = vadd.f32 %v2121_v9, %v2076_v23 }
 0x810   : > { %2581 = vperm.xlu1 %3027, %v3075_v45   ;;  %2577 = vperm.xlu0 %3026, %v3076_v36  }
 0x811   : > { %v2167_v31 = vpop.permute.xlu2 %2166 }
 0x812   : > { %v2012_v33 = vpop.permute.xlu1 %2011  ;;  %v2004_v37 = vpop.permute.xlu0 %2003  ;;  %v2177_v36 = vmul.f32 %v2167_v31, %v2140_v54  ;;  %v2178_v29 = vmul.f32 %v2167_v31, %v2141_v21 }
 0x813   : > { %v2016_v38 = vmul.f32 %v2004_v37, %v1980_v28  ;;  %v2017_v46 = vmul.f32 %v2004_v37, %v4009_v27  ;;  %v2020_v30 = vmul.f32 %v2012_v33, %v1984_v57  ;;  %v2021_v3 = vmul.f32 %v2012_v33, %v4013_v63 }
 0x815   : > { %v2077_v55 = vadd.f32 %v2069_v39, %v2016_v38  ;;  %v2078_v60 = vadd.f32 %v2070_v43, %v2017_v46  ;;  %v2138_v39 = vld [vmem:[#allocation2 + $0x23] sm:$0xff]  ;;  %v2139_v43 = vld [vmem:[#allocation2 + $0x2b] sm:$0xff] }
 0x816   : > { %v2191_v38 = vld [vmem:[#allocation2 + $0x24] sm:$0xff]  ;;  %v2192_v46 = vld [vmem:[#allocation2 + $0x2c] sm:$0xff] }
 0x819   : > { %v2216_v51 = vpop.permute.xlu2 %2215 }
 0x81a   : > { %v2065_v44 = vpop.permute.xlu1 %2064  ;;  %v2061_v34 = vpop.permute.xlu0 %2060  ;;  %v2228_v56 = vmul.f32 %v2216_v51, %v2191_v38 }
 0x81b   : > { %v2073_v59 = vmul.f32 %v2065_v44, %v2036_v62  ;;  %v2074_v50 = vmul.f32 %v2065_v44, %v4015_v48  ;;  %v2071_v49 = vmul.f32 %v2061_v34, %v2034_v32  ;;  %v2072_v53 = vmul.f32 %v2061_v34, %v4019_v41 }
 0x81c   : > { %v2229_v44 = vmul.f32 %v2216_v51, %v2192_v46 }
 0x81d   : > { %v2081_v11 = vadd.f32 %v2073_v59, %v2020_v30  ;;  %v2082_v42 = vadd.f32 %v2074_v50, %v2021_v3  ;;  %v2079_v12 = vadd.f32 %v2071_v49, %v2018_v4  ;;  %v2080_v52 = vadd.f32 %v2072_v53, %v2019_v10  ;;  %v2143_v50 = vld [vmem:[#allocation2 + $0x6b] sm:$0xff] }
 0x81f   : > { %v2134_v7 = vadd.f32 %v2126_v6, %v2081_v11  ;;  %v2135_v13 = vadd.f32 %v2127_v61, %v2082_v42  ;;  %v2195_v61 = vld [vmem:[#allocation2 + $0x64] sm:$0xff]  ;;  %v2196_v11 = vld [vmem:[#allocation2 + $0x6c] sm:$0xff] }
 0x820   : > { %v2194_v42 = vld [vmem:[#allocation2 + $0x4c] sm:$0xff] }
 0x821   : > { %v4034_v23 = vpop.permute.xlu2 %2264 }
 0x822   : > { %v2114_v15 = vpop.permute.xlu1 %2113  ;;  %v2110_v22 = vpop.permute.xlu0 %2109 }
 0x823   : > { %v2124_v20 = vmul.f32 %v2114_v15, %v2087_v14  ;;  %v2125_v1 = vmul.f32 %v2114_v15, %v4028_v17  ;;  %v2122_v16 = vmul.f32 %v2110_v22, %v2085_v47  ;;  %v2123_v45 = vmul.f32 %v2110_v22, %v4030_v19 }
 0x825   : > { %v2132_v9 = vadd.f32 %v2124_v20, %v2079_v12  ;;  %v2133_v35 = vadd.f32 %v2125_v1, %v2080_v52  ;;  %v2130_v25 = vadd.f32 %v2122_v16, %v2077_v55  ;;  %v2131_v28 = vadd.f32 %v2123_v45, %v2078_v60  ;;  %v2142_v60 = vld [vmem:[#allocation2 + $0x63] sm:$0xff] }
 0x827   : > { %v4036_v33 = vadd.f32 %v2177_v36, %v2132_v9  ;;  %v2186_v37 = vadd.f32 %v2178_v29, %v2133_v35 }
 0x829   : > { %v4042_v55 = vpop.permute.xlu2 %2276 }
 0x82a   : > { %v2163_v40 = vpop.permute.xlu1 %2162  ;;  %v2159_v32 = vpop.permute.xlu0 %2158 }
 0x82b   : > { %v2175_v57 = vmul.f32 %v2163_v40, %v2138_v39  ;;  %v2176_v62 = vmul.f32 %v2163_v40, %v2139_v43  ;;  %v2189_v39 = vld [vmem:[#allocation2 + $0x4] sm:$0xff]  ;;  %v2190_v43 = vld [vmem:[#allocation2 + $0xc] sm:$0xff] }
 0x82d   : > { %v2183_v31 = vadd.f32 %v2175_v57, %v2130_v25  ;;  %v2184_v30 = vadd.f32 %v2176_v62, %v2131_v28  ;;  %v2136_v28 = vld [vmem:[#allocation2 + $0x3] sm:$0xff] }
 0x82e   : > { %v2173_v38 = vmul.f32 %v2159_v32, %v2136_v28  ;;  %v2246_v28 = vld [vmem:[#allocation2 + $0x45] sm:$0xff] }
 0x82f   : > { %v4038_v3 = vadd.f32 %v2228_v56, %v2183_v31  ;;  %v4040_v59 = vadd.f32 %v2229_v44, %v2184_v30  ;;  %v2242_v44 = vld [vmem:[#allocation2 + $0x5] sm:$0xff] }
 0x830   : > { %v2181_v31 = vadd.f32 %v2173_v38, %v4003_v24 }
 0x831   : > { %v4044_v51 = vpop.permute.xlu2 %2325 }
 0x832   : > { %v2212_v34 = vpop.permute.xlu1 %2211  ;;  %v2171_v4 = vpop.permute.xlu0 %2170 }
 0x833   : > { %v2179_v10 = vmul.f32 %v2171_v4, %v2142_v60  ;;  %v2180_v49 = vmul.f32 %v2171_v4, %v2143_v50  ;;  %v2226_v40 = vmul.f32 %v2212_v34, %v2189_v39  ;;  %v2227_v57 = vmul.f32 %v2212_v34, %v2190_v43  ;;  %v2243_v50 = vld [vmem:[#allocation2 + $0xd] sm:$0xff] }
 0x834   : > { %v2295_v4 = vld [vmem:[#allocation2 + $0x6] sm:$0xff]  ;;  %v2279_v34 = vmul.f32 %v4034_v23, %v2242_v44 }
 0x835   : > { %v2187_v53 = vadd.f32 %v2179_v10, %v2134_v7  ;;  %v2188_v6 = vadd.f32 %v2180_v49, %v2135_v13  ;;  %v2296_v10 = vld [vmem:[#allocation2 + $0xe] sm:$0xff]  ;;  %v2234_v49 = vadd.f32 %v2226_v40, %v2181_v31  ;;  %v2244_v44 = vld [vmem:[#allocation2 + $0x25] sm:$0xff] }
 0x839   : > { %v4054_v13 = vpop.permute.xlu2 %2374 }
 0x83a   : > { %v2224_v12 = vpop.permute.xlu1 %2223  ;;  %v2220_v47 = vpop.permute.xlu0 %2219 }
 0x83b   : > { %v2232_v52 = vmul.f32 %v2224_v12, %v2195_v61  ;;  %v2233_v14 = vmul.f32 %v2224_v12, %v2196_v11  ;;  %v2231_v54 = vmul.f32 %v2220_v47, %v2194_v42  ;;  %v2280_v61 = vmul.f32 %v4034_v23, %v2243_v50  ;;  %v2193_v12 = vld [vmem:[#allocation2 + $0x44] sm:$0xff]  ;;  %v2245_v23 = vld [vmem:[#allocation2 + $0x2d] sm:$0xff] }
 0x83c   : > { %v2230_v38 = vmul.f32 %v2220_v47, %v2193_v12 }
 0x83d   : > { %v4046_v21 = vadd.f32 %v2232_v52, %v2187_v53  ;;  %v4048_v15 = vadd.f32 %v2233_v14, %v2188_v6  ;;  %v4050_v20 = vadd.f32 %v2231_v54, %v2186_v37  ;;  %v2137_v37 = vld [vmem:[#allocation2 + $0xb] sm:$0xff]  ;;  %v2287_v52 = vadd.f32 %v2279_v34, %v2234_v49 }
 0x83e   : > { %v2174_v46 = vmul.f32 %v2159_v32, %v2137_v37  ;;  %v2348_v6 = vld [vmem:[#allocation2 + $0x7] sm:$0xff]  ;;  %v2349_v32 = vld [vmem:[#allocation2 + $0xf] sm:$0xff]  ;;  %v2238_v47 = vadd.f32 %v2230_v38, %v4036_v33 }
 0x83f   : > { %v2508_v34 = vld [vmem:[#allocation2 + $0x12] sm:$0xff] }
 0x840   : > { %v2182_v30 = vadd.f32 %v2174_v46, %v4005_v8  ;;  %v2402_v46 = vld [vmem:[#allocation2 + $0x10] sm:$0xff] }
 0x841   : > { %v2424_v45 = vpop.permute.xlu2 %2423 }
 0x842   : > { %v4052_v1 = vpop.permute.xlu1 %2272  ;;  %v2269_v7 = vpop.permute.xlu0 %2268  ;;  %v2235_v53 = vadd.f32 %v2227_v57, %v2182_v30  ;;  %v2455_v57 = vld [vmem:[#allocation2 + $0x11] sm:$0xff]  ;;  %v2438_v50 = vmul.f32 %v2424_v45, %v3987_v18 }
 0x843   : > { %v2283_v30 = vmul.f32 %v4052_v1, %v2246_v28  ;;  %v2350_v28 = vld [vmem:[#allocation2 + $0x27] sm:$0xff] }
 0x844   : > { %v2288_v24 = vadd.f32 %v2280_v61, %v2235_v53  ;;  %v2248_v61 = vld [vmem:[#allocation2 + $0x65] sm:$0xff] }
 0x845   : > { %v2285_v38 = vmul.f32 %v4042_v55, %v2248_v61 }
 0x847   : > { %v2293_v61 = vadd.f32 %v2285_v38, %v4046_v21 }
 0x849   : > { %v4060_v9 = vpop.permute.xlu2 %2435 }
 0x84a   : > { %v4056_v22 = vpop.permute.xlu1 %2321  ;;  %v2318_v16 = vpop.permute.xlu0 %2317 }
 0x84b   : > { %v2332_v11 = vmul.f32 %v2318_v16, %v2295_v4  ;;  %v2333_v42 = vmul.f32 %v2318_v16, %v2296_v10  ;;  %v2297_v4 = vld [vmem:[#allocation2 + $0x26] sm:$0xff]  ;;  %v2298_v10 = vld [vmem:[#allocation2 + $0x2e] sm:$0xff] }
 0x84c   : > { %v2335_v18 = vmul.f32 %v4056_v22, %v2298_v10 }
 0x84d   : > { %v2340_v37 = vadd.f32 %v2332_v11, %v2287_v52  ;;  %v2341_v39 = vadd.f32 %v2333_v42, %v2288_v24  ;;  %v2249_v11 = vld [vmem:[#allocation2 + $0x6d] sm:$0xff]  ;;  %v2291_v24 = vadd.f32 %v2283_v30, %v2238_v47 }
 0x84e   : > { %v2299_v52 = vld [vmem:[#allocation2 + $0x46] sm:$0xff]  ;;  %v2457_v47 = vld [vmem:[#allocation2 + $0x31] sm:$0xff] }
 0x851   : > { %v4066_v62 = vpop.permute.xlu2 %2484 }
 0x852   : > { %v2371_v36 = vpop.permute.xlu1 %2370  ;;  %v4058_v29 = vpop.permute.xlu0 %2329 }
 0x853   : > { %v2385_v14 = vmul.f32 %v2371_v36, %v2348_v6  ;;  %v2386_v8 = vmul.f32 %v2371_v36, %v2349_v32  ;;  %v2439_v36 = vmul.f32 %v2424_v45, %v2402_v46  ;;  %v2281_v6 = vmul.f32 %v2269_v7, %v2244_v44  ;;  %v2352_v45 = vld [vmem:[#allocation2 + $0x47] sm:$0xff] }
 0x854   : > { %v2282_v32 = vmul.f32 %v2269_v7, %v2245_v23  ;;  %v2286_v46 = vmul.f32 %v4042_v55, %v2249_v11  ;;  %v2247_v23 = vld [vmem:[#allocation2 + $0x4d] sm:$0xff] }
 0x855   : > { %v2393_v31 = vadd.f32 %v2385_v14, %v2340_v37  ;;  %v2394_v16 = vadd.f32 %v2386_v8, %v2341_v39  ;;  %v2334_v14 = vmul.f32 %v4056_v22, %v2297_v4  ;;  %v2336_v22 = vmul.f32 %v4044_v51, %v2299_v52  ;;  %v2302_v55 = vld [vmem:[#allocation2 + $0x6e] sm:$0xff] }
 0x856   : > { %v2290_v44 = vadd.f32 %v2282_v32, %v4040_v59  ;;  %v2354_v11 = vld [vmem:[#allocation2 + $0x67] sm:$0xff] }
 0x857   : > { %v2446_v42 = vadd.f32 %v2438_v50, %v2393_v31  ;;  %v2447_v12 = vadd.f32 %v2439_v36, %v2394_v16  ;;  %v2404_v16 = vld [vmem:[#allocation2 + $0x30] sm:$0xff] }
 0x858   : > { %v2343_v10 = vadd.f32 %v2335_v18, %v2290_v44  ;;  %v2406_v44 = vld [vmem:[#allocation2 + $0x50] sm:$0xff] }
 0x859   : > { %v4078_v40 = vpop.permute.xlu2 %2533 }
 0x85a   : > { %v4062_v35 = vpop.permute.xlu1 %2382  ;;  %v4064_v25 = vpop.permute.xlu0 %2378 }
 0x85b   : > { %v2389_v31 = vmul.f32 %v4064_v25, %v2352_v45  ;;  %v2300_v45 = vld [vmem:[#allocation2 + $0x4e] sm:$0xff] }
 0x862   : > { %v4068_v56 = vpop.permute.xlu1 %2431  ;;  %v4072_v60 = vpop.permute.xlu0 %2427 }
 0x863   : > { %v2442_v59 = vmul.f32 %v4068_v56, %v4017_v5 }
 0x86a   : > { %v4076_v54 = vpop.permute.xlu1 %2480  ;;  %v2477_v43 = vpop.permute.xlu0 %2476 }
 0x86b   : > { %v2491_v49 = vmul.f32 %v2477_v43, %v3985_v0  ;;  %v2492_v53 = vmul.f32 %v2477_v43, %v2455_v57  ;;  %v2351_v0 = vld [vmem:[#allocation2 + $0x2f] sm:$0xff]  ;;  %v2289_v57 = vadd.f32 %v2281_v6, %v4038_v3  ;;  %v2344_v3 = vadd.f32 %v2336_v22, %v2291_v24 }
 0x86c   : > { %v2388_v36 = vmul.f32 %v4054_v13, %v2351_v0  ;;  %v2339_v24 = vmul.f32 %v4058_v29, %v2302_v55  ;;  %v2493_v21 = vmul.f32 %v4076_v54, %v4007_v26  ;;  %v2494_v18 = vmul.f32 %v4076_v54, %v2457_v47  ;;  %v2408_v22 = vld [vmem:[#allocation2 + $0x70] sm:$0xff] }
 0x86d   : > { %v2499_v37 = vadd.f32 %v2491_v49, %v2446_v42  ;;  %v2500_v39 = vadd.f32 %v2492_v53, %v2447_v12  ;;  %v2342_v4 = vadd.f32 %v2334_v14, %v2289_v57  ;;  %v2301_v49 = vld [vmem:[#allocation2 + $0x66] sm:$0xff]  ;;  %v2574_v53 = vpop.permute.xlu2 %2573  ;;  %v2355_v42 = vld [vmem:[#allocation2 + $0x6f] sm:$0xff]  ;;  %v2441_v12 = vmul.f32 %v4072_v60, %v2404_v16 }
 0x86e   : > { %v2338_v52 = vmul.f32 %v4058_v29, %v2301_v49  ;;  %v2397_v14 = vadd.f32 %v2389_v31, %v2344_v3  ;;  %v2392_v29 = vmul.f32 %v4062_v35, %v2355_v42  ;;  %v2495_v26 = vmul.f32 %v4066_v62, %v4019_v41  ;;  %v2510_v57 = vld [vmem:[#allocation2 + $0x32] sm:$0xff] }
 0x86f   : > { %v2461_v16 = vld [vmem:[#allocation2 + $0x71] sm:$0xff]  ;;  %v2546_v41 = vmul.f32 %v4078_v40, %v4030_v19 }
 0x870   : > { %v2450_v0 = vadd.f32 %v2442_v59, %v2397_v14  ;;  %v2346_v38 = vadd.f32 %v2338_v52, %v2293_v61 }
 0x872   : > { %v2530_v8 = vpop.permute.xlu1 %2529  ;;  %v4087_v43 = vpop.permute.xlu0 %2488 }
 0x873   : > { %v2544_v33 = vmul.f32 %v2530_v8, %v3990_v58  ;;  %v2545_v7 = vmul.f32 %v2530_v8, %v2508_v34  ;;  %v2387_v58 = vmul.f32 %v4054_v13, %v2350_v28  ;;  %v2284_v34 = vmul.f32 %v4052_v1, %v2247_v23  ;;  %v2353_v28 = vld [vmem:[#allocation2 + $0x4f] sm:$0xff] }
 0x874   : > { %v2440_v13 = vmul.f32 %v4072_v60, %v4009_v27  ;;  %v2396_v1 = vadd.f32 %v2388_v36, %v2343_v10  ;;  %v2294_v60 = vadd.f32 %v2286_v46, %v4048_v15  ;;  %v2391_v8 = vmul.f32 %v4062_v35, %v2354_v11 }
 0x875   : > { %v2552_v30 = vadd.f32 %v2544_v33, %v2499_v37  ;;  %v2553_v50 = vadd.f32 %v2545_v7, %v2500_v39  ;;  %v2395_v5 = vadd.f32 %v2387_v58, %v2342_v4  ;;  %v2292_v39 = vadd.f32 %v2284_v34, %v4050_v20 }
 0x876   : > { %v2449_v7 = vadd.f32 %v2441_v12, %v2396_v1  ;;  %v2347_v54 = vadd.f32 %v2339_v24, %v2294_v60  ;;  %v2337_v46 = vmul.f32 %v4044_v51, %v2300_v45  ;;  %v2390_v35 = vmul.f32 %v4064_v25, %v2353_v28 }
 0x877   : > { %v2589_v6 = vadd.f32 %v2574_v53, %v2553_v50  ;;  %v2588_v32 = vadd.f32 %v2574_v53, %v2552_v30  ;;  %v2448_v33 = vadd.f32 %v2440_v13, %v2395_v5  ;;  %v2399_v20 = vadd.f32 %v2391_v8, %v2346_v38 }
 0x878   : > { %v2502_v31 = vadd.f32 %v2494_v18, %v2449_v7  ;;  %v2400_v30 = vadd.f32 %v2392_v29, %v2347_v54  ;;  %v2503_v50 = vadd.f32 %v2495_v26, %v2450_v0  ;;  %v2547_v58 = vmul.f32 %v4078_v40, %v2510_v57  ;;  %v2459_v40 = vld [vmem:[#allocation2 + $0x51] sm:$0xff] }
 0x879   : > { %2606 = vrot.lane.b32.xlu1 %v2589_v6, %s3135_s13  ;;  %2604 = vrot.lane.b32.xlu0 %v2588_v32, %s3135_s13  ;;  %v2501_v23 = vadd.f32 %v2493_v21, %v2448_v33  ;;  %v2345_v36 = vadd.f32 %v2337_v46, %v2292_v39  ;;  %v2443_v4 = vmul.f32 %v4068_v56, %v2406_v44  ;;  %v2512_v32 = vld [vmem:[#allocation2 + $0x52] sm:$0xff] }
 0x87a   : > { %v2542_v27 = vpop.permute.xlu1 %2541  ;;  %v2538_v37 = vpop.permute.xlu0 %2537  ;;  %v2444_v51 = vmul.f32 %v4060_v9, %v4013_v63  ;;  %v2445_v25 = vmul.f32 %v4060_v9, %v2408_v22  ;;  %v2498_v10 = vmul.f32 %v4087_v43, %v2461_v16  ;;  %v2497_v53 = vmul.f32 %v4087_v43, %v4015_v48 }
 0x87b   : > { %v2548_v15 = vmul.f32 %v2538_v37, %v4028_v17  ;;  %v2514_v17 = vld [vmem:[#allocation2 + $0x72] sm:$0xff]  ;;  %v2398_v55 = vadd.f32 %v2390_v35, %v2345_v36  ;;  %v2554_v19 = vadd.f32 %v2546_v41, %v2501_v23  ;;  %v2555_v59 = vadd.f32 %v2547_v58, %v2502_v31 }
 0x87c   : > { %v2452_v47 = vadd.f32 %v2444_v51, %v2399_v20  ;;  %v2453_v6 = vadd.f32 %v2445_v25, %v2400_v30  ;;  %v2551_v56 = vmul.f32 %v2542_v27, %v2514_v17  ;;  %v2550_v9 = vmul.f32 %v2542_v27, %v4021_v2  ;;  %v2586_v2 = vpop.permute.xlu2 %2585 }
 0x87d   : > { %v2556_v49 = vadd.f32 %v2548_v15, %v2503_v50  ;;  %v2451_v63 = vadd.f32 %v2443_v4, %v2398_v55  ;;  %v2496_v48 = vmul.f32 %v4066_v62, %v2459_v40  ;;  %v2549_v12 = vmul.f32 %v2538_v37, %v2512_v32 }
 0x87e   : > { %v2506_v13 = vadd.f32 %v2498_v10, %v2453_v6  ;;  %v2505_v43 = vadd.f32 %v2497_v53, %v2452_v47 }
 0x87f   : > { %v2504_v14 = vadd.f32 %v2496_v48, %v2451_v63 }
 0x880   : > { %v2559_v52 = vadd.f32 %v2551_v56, %v2506_v13  ;;  %v2558_v24 = vadd.f32 %v2550_v9, %v2505_v43 }
 0x881   : > { %v2557_v5 = vadd.f32 %v2549_v12, %v2504_v14 }
 0x882   : > { %v2582_v3 = vpop.permute.xlu1 %2581  ;;  %v2578_v61 = vpop.permute.xlu0 %2577  ;;  %v2595_v1 = vadd.f32 %v2586_v2, %v2559_v52  ;;  %v2594_v18 = vadd.f32 %v2586_v2, %v2558_v24 }
 0x883   : > { %v2592_v34 = vadd.f32 %v2582_v3, %v2556_v49  ;;  %v2590_v11 = vadd.f32 %v2578_v61, %v2554_v19  ;;  %v2591_v42 = vadd.f32 %v2578_v61, %v2555_v59  ;;  %v2593_v21 = vadd.f32 %v2582_v3, %v2557_v5 }
 0x885   : > { %2612 = vrot.lane.b32.xlu1 %v2592_v34, %s3135_s13  ;;  %2608 = vrot.lane.b32.xlu2 %v2590_v11, %s3135_s13 }
 0x886   : > { %2610 = vrot.lane.b32.xlu0 %v2591_v42, %s3135_s13 }
 0x88d   : > { %2618 = vrot.lane.b32.xlu1 %v2595_v1, %s3135_s13  ;;  %2614 = vrot.lane.b32.xlu2 %v2593_v21, %s3135_s13 }
 0x88e   : > { %2616 = vrot.lane.b32.xlu0 %v2594_v18, %s3135_s13 }
 0x8df   : > { %v2609_v62 = vpop.permute.xlu2 %2608 }
 0x8e0   : > { %2631 = vst.msk [vmem:[%s3220_s19 + $0x10] sm:$0xff] %vm2628_vm5, %v2609_v62 }
 0x8e7   : > { %v2615_v27 = vpop.permute.xlu2 %2614 }
 0x8e8   : > { %2634 = vst.msk [vmem:[%s3220_s19 + $0x28] sm:$0xff] %vm2628_vm5, %v2615_v27 }
 0x8eb   : > { %v2607_v45 = vpop.permute.xlu1 %2606  ;;  %v2605_v60 = vpop.permute.xlu0 %2604 }
 0x8ec   : > { %2630 = vst.msk [vmem:[%s3220_s19 + $0x8] sm:$0xff] %vm2628_vm5, %v2607_v45 }
 0x8ed   : > { %2629 = vst.msk [vmem:[%s3220_s19] sm:$0xff] %vm2628_vm5, %v2605_v60 }
 0x8f7   : > { %v2613_v8 = vpop.permute.xlu1 %2612 }
 0x8f8   : > { %2633 = vst.msk [vmem:[%s3220_s19 + $0x20] sm:$0xff] %vm2628_vm5, %v2613_v8  ;;  %v2611_v29 = vpop.permute.xlu0 %2610 }
 0x8f9   : > { %2632 = vst.msk [vmem:[%s3220_s19 + $0x18] sm:$0xff] %vm2628_vm5, %v2611_v29 }
 0x8ff   : > { %v2619_v28 = vpop.permute.xlu1 %2618 }
 0x900   : > { %2636 = vst.msk [vmem:[%s3220_s19 + $0x38] sm:$0xff] %vm2628_vm5, %v2619_v28  ;;  %v2617_v0 = vpop.permute.xlu0 %2616 }
 0x901   : > { %2635 = vst.msk [vmem:[%s3220_s19 + $0x30] sm:$0xff] %vm2628_vm5, %v2617_v0 }
 0x902 PF: > { %s17_s28 = sadd.s32 1, %s3115_s28   ;;  %s4177_s24 = smov %s3107_s26 }
 0x903   : > { %p14_p10 = scmp.ge.s32.totalorder %s17_s28, 8   ;;  %s4178_s25 = smov %s3111_s27 }
 0x904   : > { %s4179_s26 = smov %s4182_s29  ;;  %s4180_s27 = smov %s4186_s30 }
 0x905   :  { %16 = sbr.rel (!%p14_p10) target bundleno = 3 (0x3), region = 118 }

</bundles_post_ra>
